<compile_context>
chip_gen: v5e
topology: v5e:2x2
jax: 0.10.0
libtpu: 0.0.40
codegen_flags: <defaults>
</compile_context>

<pallas_src>
import functools
import math

import numpy as np
import jax
import jax.numpy as jnp
from jax.experimental import pallas as pl
from jax.experimental.pallas import tpu as pltpu


# ----------------------------------------------------------------------------
# Shared math helper (used both inside the kernel and in the pure-JAX reference).
# ----------------------------------------------------------------------------

def _layernorm(y, g, b, eps=1e-5):
    mu = jnp.mean(y, axis=-1, keepdims=True)
    d = y - mu
    var = jnp.mean(d * d, axis=-1, keepdims=True)
    return d * jax.lax.rsqrt(var + eps) * g + b


# ----------------------------------------------------------------------------
# Fused whole-forward Pallas kernel.  All refs are whole arrays resident in VMEM.
#   src_ref     : (B*S, D)   batch-major, flattened activations (seq contiguous per b)
#   pe_ref      : (B*S, D)   positional-encoding table, pre-tiled over batch
#   per-layer weights stacked over L; biases / LN params kept as (L, 1, dim)
#   out_ref     : (B, num_outputs)
#   src_pe_ref  : (B*S, D)   positionally-encoded src (reshaped/transposed on host)
# ----------------------------------------------------------------------------

def _fused_forward_kernel(
    src_ref, pe_ref,
    w_in_t_ref, b_in_ref, w_o_t_ref, b_o_ref,
    w1_t_ref, b1_ref, w2_t_ref, b2_ref,
    g1_ref, be1_ref, g2_ref, be2_ref,
    w_dec_t_ref, b_dec_ref,
    out_ref, src_pe_ref,
    *, num_layers, nhead, batch, seq, scale,
):
    _, D = src_ref.shape
    B, S = batch, seq
    hd = D // nhead

    # Causal additive mask generated on-chip (no HBM operand, free VPU compare).
    row = jax.lax.broadcasted_iota(jnp.int32, (S, S), 0)
    col = jax.lax.broadcasted_iota(jnp.int32, (S, S), 1)
    mask = jnp.where(col <= row, jnp.float32(0.0), jnp.float32(-jnp.inf))

    # pos_encoder (dropout = identity): one vectorized add over the whole (B*S, D) slab.
    x = src_ref[...] + pe_ref[...]
    src_pe_ref[...] = x

    for l in range(num_layers):                    # static unroll over encoder layers
        # --- multi-head self-attention, fused QKV in_proj over ALL batch rows at once ---
        qkv = jnp.dot(x, w_in_t_ref[l], preferred_element_type=jnp.float32) + b_in_ref[l]

        attn_rows = []
        for b in range(B):                         # sequences are independent in attention
            heads = []
            for h in range(nhead):                 # heads sliced in-kernel from VMEM qkv
                q = qkv[b * S:(b + 1) * S, h * hd:(h + 1) * hd] * scale
                k = qkv[b * S:(b + 1) * S, D + h * hd: D + (h + 1) * hd]
                v = qkv[b * S:(b + 1) * S, 2 * D + h * hd: 2 * D + (h + 1) * hd]
                # scores = q @ k^T via dot_general (no explicit transpose)
                s = jax.lax.dot_general(
                    q, k, (((1,), (1,)), ((), ())),
                    preferred_element_type=jnp.float32,
                ) + mask
                m = jnp.max(s, axis=-1, keepdims=True)
                e = jnp.exp(s - m)
                p = e * pl.reciprocal(jnp.sum(e, axis=-1, keepdims=True), approx=False)
                heads.append(jnp.dot(p, v, preferred_element_type=jnp.float32))
            attn_rows.append(heads[0] if nhead == 1 else jnp.concatenate(heads, axis=-1))
        attn = attn_rows[0] if B == 1 else jnp.concatenate(attn_rows, axis=0)  # (B*S, D)

        # out_proj + residual + LayerNorm1   (whole slab at once)
        y = jnp.dot(attn, w_o_t_ref[l], preferred_element_type=jnp.float32) + b_o_ref[l]
        x = _layernorm(x + y, g1_ref[l], be1_ref[l])

        # feed-forward (relu) + residual + LayerNorm2   (whole slab at once)
        h1 = jnp.maximum(
            jnp.dot(x, w1_t_ref[l], preferred_element_type=jnp.float32) + b1_ref[l], 0.0)
        y2 = jnp.dot(h1, w2_t_ref[l], preferred_element_type=jnp.float32) + b2_ref[l]
        x = _layernorm(x + y2, g2_ref[l], be2_ref[l])

    # Decoder on the last time-step of every batch element: one (B, D) matmul.
    last = jnp.concatenate([x[b * S + S - 1: b * S + S, :] for b in range(B)], axis=0)
    out_ref[...] = (
        jnp.dot(last, w_dec_t_ref[...], preferred_element_type=jnp.float32)
        + b_dec_ref[...]
    )


# ----------------------------------------------------------------------------
# Host glue: PE table, parameter init, jitted wrapper around the single pallas_call.
# ----------------------------------------------------------------------------

def _positional_encoding(S, D):
    # Faithful to PositionalEncoding.__init__ (the PyTorch code path requires odd D).
    assert D % 2 == 1, "PositionalEncoding path in the reference requires odd d_model"
    position = np.arange(S, dtype=np.float32)[:, None]
    div_term = np.exp(np.arange(0, D, 2, dtype=np.float32) * (-math.log(10000.0) / D))
    pe = np.zeros((S, D), dtype=np.float32)
    pe[:, 0::2] = np.sin(position * div_term)
    pe[:, 1::2] = np.cos(position * div_term)[:, :-1]
    return jnp.asarray(pe)  # (S, D)


def init_params(key, num_inputs, num_outputs, num_layers, nhid, nhead):
    D, F, L = num_inputs, nhid, num_layers

    def u(k, shape, bound):
        return jax.random.uniform(k, shape, jnp.float32, -bound, bound)

    k = jax.random.split(key, 8)
    # Weights stored pre-transposed (x @ W.T + b == x @ w_t + b) and stacked over layers.
    w_in_t = jnp.swapaxes(u(k[0], (L, 3 * D, D), 1.0 / math.sqrt(D)), 1, 2)  # (L, D, 3D)
    w_o_t = jnp.swapaxes(u(k[1], (L, D, D), 1.0 / math.sqrt(D)), 1, 2)       # (L, D, D)
    w1_t = jnp.swapaxes(u(k[2], (L, F, D), 1.0 / math.sqrt(D)), 1, 2)        # (L, D, F)
    b1 = u(k[3], (L, 1, F), 1.0 / math.sqrt(D))
    w2_t = jnp.swapaxes(u(k[4], (L, D, F), 1.0 / math.sqrt(F)), 1, 2)        # (L, F, D)
    b2 = u(k[5], (L, 1, D), 1.0 / math.sqrt(F))
    # decoder: init_weights() -> bias zero, weight uniform(-0.1, 0.1)
    w_dec = u(k[6], (num_outputs, D), 0.1)
    return dict(
        w_in_t=w_in_t, b_in=jnp.zeros((L, 1, 3 * D), jnp.float32),
        w_o_t=w_o_t, b_o=jnp.zeros((L, 1, D), jnp.float32),
        w1_t=w1_t, b1=b1, w2_t=w2_t, b2=b2,
        g1=jnp.ones((L, 1, D), jnp.float32), be1=jnp.zeros((L, 1, D), jnp.float32),
        g2=jnp.ones((L, 1, D), jnp.float32), be2=jnp.zeros((L, 1, D), jnp.float32),
        w_dec_t=w_dec.T, b_dec=jnp.zeros((1, num_outputs), jnp.float32),
    )


def build_forward(num_layers, nhead, num_outputs):
    @jax.jit
    def forward(weights, src, none_state=None):
        if none_state is not None:
            src = jnp.concatenate([src[None], none_state], axis=0)
        S, B, D = src.shape
        assert D % nhead == 0
        hd = D // nhead

        pe = _positional_encoding(S, D)                      # trace-time constant (S, D)
        pe_tiled = jnp.tile(pe, (B, 1))                      # (B*S, D), constant-folded
        # Batch-major, sequence-contiguous 2-D slab for the kernel.
        src_2d = jnp.transpose(src, (1, 0, 2)).reshape(B * S, D)

        kernel = functools.partial(
            _fused_forward_kernel,
            num_layers=num_layers, nhead=nhead, batch=B, seq=S,
            scale=1.0 / math.sqrt(hd))

        vmem = pl.BlockSpec(memory_space=pltpu.MemorySpace.VMEM)
        out, src_pe_2d = pl.pallas_call(
            kernel,
            out_shape=(
                jax.ShapeDtypeStruct((B, num_outputs), jnp.float32),
                jax.ShapeDtypeStruct((B * S, D), jnp.float32),
            ),
            in_specs=[vmem] * 16,
            out_specs=(vmem, vmem),
        )(
            src_2d, pe_tiled,
            weights["w_in_t"], weights["b_in"], weights["w_o_t"], weights["b_o"],
            weights["w1_t"], weights["b1"], weights["w2_t"], weights["b2"],
            weights["g1"], weights["be1"], weights["g2"], weights["be2"],
            weights["w_dec_t"], weights["b_dec"],
        )
        src_pe = jnp.transpose(src_pe_2d.reshape(B, S, D), (1, 0, 2))  # back to (S, B, D)
        return out, src_pe

    return forward


# ----------------------------------------------------------------------------
# Pure-JAX reference (for correctness validation of the fused kernel).
# ----------------------------------------------------------------------------

def _reference_forward(weights, src, num_layers, nhead):
    S, B, D = src.shape
    hd = D // nhead
    x = src + _positional_encoding(S, D)[:, None, :]
    src_pe = x
    idx = jnp.arange(S)
    mask = jnp.where(idx[None, :] <= idx[:, None], 0.0, -jnp.inf).astype(jnp.float32)
    with jax.default_matmul_precision("float32"):
        for l in range(num_layers):
            x2d = x.reshape(S * B, D)
            qkv = (x2d @ weights["w_in_t"][l] + weights["b_in"][l]).reshape(S, B, 3 * D)
            q, k, v = qkv[..., :D], qkv[..., D:2 * D], qkv[..., 2 * D:]
            sh = lambda t: t.reshape(S, B, nhead, hd).transpose(1, 2, 0, 3)  # (B,H,S,hd)
            s = jnp.einsum("bhqd,bhkd->bhqk", sh(q), sh(k)) / math.sqrt(hd) + mask
            p = jax.nn.softmax(s, axis=-1)
            o = jnp.einsum("bhqk,bhkd->bhqd", p, sh(v))
            attn = o.transpose(2, 0, 1, 3).reshape(S * B, D)
            y = attn @ weights["w_o_t"][l] + weights["b_o"][l]
            x2d = _layernorm(x2d + y, weights["g1"][l], weights["be1"][l])
            h1 = jax.nn.relu(x2d @ weights["w1_t"][l] + weights["b1"][l])
            y2 = h1 @ weights["w2_t"][l] + weights["b2"][l]
            x2d = _layernorm(x2d + y2, weights["g2"][l], weights["be2"][l])
            x = x2d.reshape(S, B, D)
        out = x[-1] @ weights["w_dec_t"] + weights["b_dec"]
    return out, src_pe


if __name__ == "__main__":
    # Small config consistent with the module.  (PyTorch defaults are nhead=29, nhid=2;
    # we use nhead=1, nhid=32 — the kernel is generic over nhead via static head unroll.)
    S, B = 8, 2
    num_inputs, num_outputs, num_layers, nhid, nhead = 29, 16, 2, 32, 1

    key = jax.random.PRNGKey(0)
    kp, kx = jax.random.split(key)
    weights = init_params(kp, num_inputs, num_outputs, num_layers, nhid, nhead)
    src = jax.random.normal(kx, (S, B, num_inputs), jnp.float32)

    forward = build_forward(num_layers=num_layers, nhead=nhead, num_outputs=num_outputs)
    out, src_pe = forward(weights, src, None)
    jax.block_until_ready(out)
    jax.block_until_ready(src_pe)

    assert out.shape == (B, num_outputs)
    assert src_pe.shape == (S, B, num_inputs)
    assert jnp.all(jnp.isfinite(out)) and jnp.all(jnp.isfinite(src_pe))

    # Validate against the pure-JAX reference.
    ref_out, ref_src_pe = _reference_forward(weights, src, num_layers, nhead)
    assert jnp.allclose(src_pe, ref_src_pe, atol=1e-5, rtol=1e-5)
    assert jnp.allclose(out, ref_out, atol=2e-2, rtol=2e-2)

    print("KERNEL_OK")
</pallas_src>

<mosaic_0001>
module attributes {stable_mosaic.version = 11 : i64} {
  func.func @_fused_forward_kernel(%arg0: memref<16x29xf32, #tpu.memory_space<vmem>>, %arg1: memref<16x29xf32, #tpu.memory_space<vmem>>, %arg2: memref<2x29x87xf32, #tpu.memory_space<vmem>>, %arg3: memref<2x1x87xf32, #tpu.memory_space<vmem>>, %arg4: memref<2x29x29xf32, #tpu.memory_space<vmem>>, %arg5: memref<2x1x29xf32, #tpu.memory_space<vmem>>, %arg6: memref<2x29x32xf32, #tpu.memory_space<vmem>>, %arg7: memref<2x1x32xf32, #tpu.memory_space<vmem>>, %arg8: memref<2x32x29xf32, #tpu.memory_space<vmem>>, %arg9: memref<2x1x29xf32, #tpu.memory_space<vmem>>, %arg10: memref<2x1x29xf32, #tpu.memory_space<vmem>>, %arg11: memref<2x1x29xf32, #tpu.memory_space<vmem>>, %arg12: memref<2x1x29xf32, #tpu.memory_space<vmem>>, %arg13: memref<2x1x29xf32, #tpu.memory_space<vmem>>, %arg14: memref<29x16xf32, #tpu.memory_space<vmem>>, %arg15: memref<1x16xf32, #tpu.memory_space<vmem>>, %arg16: memref<2x16xf32, #tpu.memory_space<vmem>>, %arg17: memref<16x29xf32, #tpu.memory_space<vmem>>) attributes {dimension_semantics = [], scalar_prefetch = 0 : i64, scratch_operands = 0 : i64, tpu.core_type = #tpu.core_type<tc>} {
    %0 = tpu.iota {dimensions = array<i32: 0>} : vector<8x8xi32>
    %1 = tpu.iota {dimensions = array<i32: 1>} : vector<8x8xi32>
    %2 = arith.cmpi sle, %1, %0 : vector<8x8xi32>
    %cst = arith.constant 0.000000e+00 : f32
    %cst_0 = arith.constant 0xFF800000 : f32
    %3 = vector.broadcast %cst : f32 to vector<8x8xf32>
    %4 = vector.broadcast %cst_0 : f32 to vector<8x8xf32>
    %5 = arith.select %2, %3, %4 : vector<8x8xi1>, vector<8x8xf32>
    %c0 = arith.constant 0 : index
    %c0_1 = arith.constant 0 : index
    %6 = vector.load %arg0[%c0, %c0_1] : memref<16x29xf32, #tpu.memory_space<vmem>>, vector<16x29xf32>
    %c0_2 = arith.constant 0 : index
    %c0_3 = arith.constant 0 : index
    %7 = vector.load %arg1[%c0_2, %c0_3] : memref<16x29xf32, #tpu.memory_space<vmem>>, vector<16x29xf32>
    %8 = arith.addf %6, %7 : vector<16x29xf32>
    %c0_4 = arith.constant 0 : index
    %c0_5 = arith.constant 0 : index
    %9 = vector.load %arg17[%c0_4, %c0_5] : memref<16x29xf32, #tpu.memory_space<vmem>>, vector<16x29xf32>
    tpu.vector_store %arg17[%c0_4, %c0_5], %8 {strides = array<i32>} : memref<16x29xf32, #tpu.memory_space<vmem>>, vector<16x29xf32>,
    %c0_6 = arith.constant 0 : index
    %c0_7 = arith.constant 0 : index
    %c0_8 = arith.constant 0 : index
    %10 = vector.load %arg2[%c0_6, %c0_7, %c0_8] : memref<2x29x87xf32, #tpu.memory_space<vmem>>, vector<1x29x87xf32>
    %11 = vector.shape_cast %10 : vector<1x29x87xf32> to vector<29x87xf32>
    %cst_9 = arith.constant dense<0.000000e+00> : vector<16x87xf32>
    %12 = tpu.matmul %8, %11, %cst_9 {dimension_numbers = #tpu.dot_dimension_numbers<[1], [0], [0], [1], [0, 0, 1, 1], [], []>} : vector<16x29xf32>, vector<29x87xf32>, vector<16x87xf32> -> vector<16x87xf32>
    %c0_10 = arith.constant 0 : index
    %c0_11 = arith.constant 0 : index
    %c0_12 = arith.constant 0 : index
    %13 = vector.load %arg3[%c0_10, %c0_11, %c0_12] : memref<2x1x87xf32, #tpu.memory_space<vmem>>, vector<1x1x87xf32>
    %14 = vector.shape_cast %13 : vector<1x1x87xf32> to vector<1x87xf32>
    %15 = vector.broadcast %14 : vector<1x87xf32> to vector<16x87xf32>
    %16 = arith.addf %12, %15 : vector<16x87xf32>
    %17 = vector.extract_strided_slice %16 {offsets = [0, 0], sizes = [8, 29], strides = [1, 1]} : vector<16x87xf32> to vector<8x29xf32>
    %cst_13 = arith.constant 0.185695335 : f32
    %18 = vector.broadcast %cst_13 : f32 to vector<8x29xf32>
    %19 = arith.mulf %17, %18 : vector<8x29xf32>
    %20 = vector.extract_strided_slice %16 {offsets = [0, 29], sizes = [8, 29], strides = [1, 1]} : vector<16x87xf32> to vector<8x29xf32>
    %21 = vector.extract_strided_slice %16 {offsets = [0, 58], sizes = [8, 29], strides = [1, 1]} : vector<16x87xf32> to vector<8x29xf32>
    %cst_14 = arith.constant dense<0.000000e+00> : vector<8x8xf32>
    %22 = tpu.matmul %19, %20, %cst_14 {dimension_numbers = #tpu.dot_dimension_numbers<[1], [1], [0], [0], [0, 0, 1, 0], [], []>} : vector<8x29xf32>, vector<8x29xf32>, vector<8x8xf32> -> vector<8x8xf32>
    %23 = arith.addf %22, %5 : vector<8x8xf32>
    %cst_15 = arith.constant dense<0xFF800000> : vector<8xf32>
    %24 = vector.multi_reduction <maximumf>, %23, %cst_15 [1] : vector<8x8xf32> to vector<8xf32>
    %25 = vector.shape_cast %24 : vector<8xf32> to vector<8x1xf32>
    %26 = vector.broadcast %25 : vector<8x1xf32> to vector<8x8xf32>
    %27 = arith.subf %23, %26 : vector<8x8xf32>
    %28 = math.exp %27 : vector<8x8xf32>
    %cst_16 = arith.constant dense<0.000000e+00> : vector<8xf32>
    %29 = vector.multi_reduction <add>, %28, %cst_16 [1] : vector<8x8xf32> to vector<8xf32>
    %30 = vector.shape_cast %29 : vector<8xf32> to vector<8x1xf32>
    %31 = tpu.reciprocal %30 : vector<8x1xf32> -> vector<8x1xf32>
    %32 = vector.broadcast %31 : vector<8x1xf32> to vector<8x8xf32>
    %33 = arith.mulf %28, %32 : vector<8x8xf32>
    %cst_17 = arith.constant dense<0.000000e+00> : vector<8x29xf32>
    %34 = tpu.matmul %33, %21, %cst_17 {dimension_numbers = #tpu.dot_dimension_numbers<[1], [0], [0], [1], [0, 0, 1, 1], [], []>} : vector<8x8xf32>, vector<8x29xf32>, vector<8x29xf32> -> vector<8x29xf32>
    %35 = vector.extract_strided_slice %16 {offsets = [8, 0], sizes = [8, 29], strides = [1, 1]} : vector<16x87xf32> to vector<8x29xf32>
    %cst_18 = arith.constant 0.185695335 : f32
    %36 = vector.broadcast %cst_18 : f32 to vector<8x29xf32>
    %37 = arith.mulf %35, %36 : vector<8x29xf32>
    %38 = vector.extract_strided_slice %16 {offsets = [8, 29], sizes = [8, 29], strides = [1, 1]} : vector<16x87xf32> to vector<8x29xf32>
    %39 = vector.extract_strided_slice %16 {offsets = [8, 58], sizes = [8, 29], strides = [1, 1]} : vector<16x87xf32> to vector<8x29xf32>
    %cst_19 = arith.constant dense<0.000000e+00> : vector<8x8xf32>
    %40 = tpu.matmul %37, %38, %cst_19 {dimension_numbers = #tpu.dot_dimension_numbers<[1], [1], [0], [0], [0, 0, 1, 0], [], []>} : vector<8x29xf32>, vector<8x29xf32>, vector<8x8xf32> -> vector<8x8xf32>
    %41 = arith.addf %40, %5 : vector<8x8xf32>
    %cst_20 = arith.constant dense<0xFF800000> : vector<8xf32>
    %42 = vector.multi_reduction <maximumf>, %41, %cst_20 [1] : vector<8x8xf32> to vector<8xf32>
    %43 = vector.shape_cast %42 : vector<8xf32> to vector<8x1xf32>
    %44 = vector.broadcast %43 : vector<8x1xf32> to vector<8x8xf32>
    %45 = arith.subf %41, %44 : vector<8x8xf32>
    %46 = math.exp %45 : vector<8x8xf32>
    %cst_21 = arith.constant dense<0.000000e+00> : vector<8xf32>
    %47 = vector.multi_reduction <add>, %46, %cst_21 [1] : vector<8x8xf32> to vector<8xf32>
    %48 = vector.shape_cast %47 : vector<8xf32> to vector<8x1xf32>
    %49 = tpu.reciprocal %48 : vector<8x1xf32> -> vector<8x1xf32>
    %50 = vector.broadcast %49 : vector<8x1xf32> to vector<8x8xf32>
    %51 = arith.mulf %46, %50 : vector<8x8xf32>
    %cst_22 = arith.constant dense<0.000000e+00> : vector<8x29xf32>
    %52 = tpu.matmul %51, %39, %cst_22 {dimension_numbers = #tpu.dot_dimension_numbers<[1], [0], [0], [1], [0, 0, 1, 1], [], []>} : vector<8x8xf32>, vector<8x29xf32>, vector<8x29xf32> -> vector<8x29xf32>
    %53 = tpu.concatenate %34, %52 in 0 : vector<8x29xf32>, vector<8x29xf32> -> vector<16x29xf32>
    %c0_23 = arith.constant 0 : index
    %c0_24 = arith.constant 0 : index
    %c0_25 = arith.constant 0 : index
    %54 = vector.load %arg4[%c0_23, %c0_24, %c0_25] : memref<2x29x29xf32, #tpu.memory_space<vmem>>, vector<1x29x29xf32>
    %55 = vector.shape_cast %54 : vector<1x29x29xf32> to vector<29x29xf32>
    %cst_26 = arith.constant dense<0.000000e+00> : vector<16x29xf32>
    %56 = tpu.matmul %53, %55, %cst_26 {dimension_numbers = #tpu.dot_dimension_numbers<[1], [0], [0], [1], [0, 0, 1, 1], [], []>} : vector<16x29xf32>, vector<29x29xf32>, vector<16x29xf32> -> vector<16x29xf32>
    %c0_27 = arith.constant 0 : index
    %c0_28 = arith.constant 0 : index
    %c0_29 = arith.constant 0 : index
    %57 = vector.load %arg5[%c0_27, %c0_28, %c0_29] : memref<2x1x29xf32, #tpu.memory_space<vmem>>, vector<1x1x29xf32>
    %58 = vector.shape_cast %57 : vector<1x1x29xf32> to vector<1x29xf32>
    %59 = vector.broadcast %58 : vector<1x29xf32> to vector<16x29xf32>
    %60 = arith.addf %56, %59 : vector<16x29xf32>
    %61 = arith.addf %8, %60 : vector<16x29xf32>
    %c0_30 = arith.constant 0 : index
    %c0_31 = arith.constant 0 : index
    %c0_32 = arith.constant 0 : index
    %62 = vector.load %arg10[%c0_30, %c0_31, %c0_32] : memref<2x1x29xf32, #tpu.memory_space<vmem>>, vector<1x1x29xf32>
    %63 = vector.shape_cast %62 : vector<1x1x29xf32> to vector<1x29xf32>
    %c0_33 = arith.constant 0 : index
    %c0_34 = arith.constant 0 : index
    %c0_35 = arith.constant 0 : index
    %64 = vector.load %arg11[%c0_33, %c0_34, %c0_35] : memref<2x1x29xf32, #tpu.memory_space<vmem>>, vector<1x1x29xf32>
    %65 = vector.shape_cast %64 : vector<1x1x29xf32> to vector<1x29xf32>
    %cst_36 = arith.constant dense<0.000000e+00> : vector<16xf32>
    %66 = vector.multi_reduction <add>, %61, %cst_36 [1] : vector<16x29xf32> to vector<16xf32>
    %67 = vector.shape_cast %66 : vector<16xf32> to vector<16x1xf32>
    %cst_37 = arith.constant 2.900000e+01 : f32
    %68 = vector.broadcast %cst_37 : f32 to vector<16x1xf32>
    %69 = arith.divf %67, %68 : vector<16x1xf32>
    %70 = vector.broadcast %69 : vector<16x1xf32> to vector<16x29xf32>
    %71 = arith.subf %61, %70 : vector<16x29xf32>
    %72 = arith.mulf %71, %71 : vector<16x29xf32>
    %cst_38 = arith.constant dense<0.000000e+00> : vector<16xf32>
    %73 = vector.multi_reduction <add>, %72, %cst_38 [1] : vector<16x29xf32> to vector<16xf32>
    %74 = vector.shape_cast %73 : vector<16xf32> to vector<16x1xf32>
    %cst_39 = arith.constant 2.900000e+01 : f32
    %75 = vector.broadcast %cst_39 : f32 to vector<16x1xf32>
    %76 = arith.divf %74, %75 : vector<16x1xf32>
    %cst_40 = arith.constant 9.99999974E-6 : f32
    %77 = vector.broadcast %cst_40 : f32 to vector<16x1xf32>
    %78 = arith.addf %76, %77 : vector<16x1xf32>
    %79 = math.rsqrt %78 : vector<16x1xf32>
    %80 = vector.broadcast %79 : vector<16x1xf32> to vector<16x29xf32>
    %81 = arith.mulf %71, %80 : vector<16x29xf32>
    %82 = vector.broadcast %63 : vector<1x29xf32> to vector<16x29xf32>
    %83 = arith.mulf %81, %82 : vector<16x29xf32>
    %84 = vector.broadcast %65 : vector<1x29xf32> to vector<16x29xf32>
    %85 = arith.addf %83, %84 : vector<16x29xf32>
    %c0_41 = arith.constant 0 : index
    %c0_42 = arith.constant 0 : index
    %c0_43 = arith.constant 0 : index
    %86 = vector.load %arg6[%c0_41, %c0_42, %c0_43] : memref<2x29x32xf32, #tpu.memory_space<vmem>>, vector<1x29x32xf32>
    %87 = vector.shape_cast %86 : vector<1x29x32xf32> to vector<29x32xf32>
    %cst_44 = arith.constant dense<0.000000e+00> : vector<16x32xf32>
    %88 = tpu.matmul %85, %87, %cst_44 {dimension_numbers = #tpu.dot_dimension_numbers<[1], [0], [0], [1], [0, 0, 1, 1], [], []>} : vector<16x29xf32>, vector<29x32xf32>, vector<16x32xf32> -> vector<16x32xf32>
    %c0_45 = arith.constant 0 : index
    %c0_46 = arith.constant 0 : index
    %c0_47 = arith.constant 0 : index
    %89 = vector.load %arg7[%c0_45, %c0_46, %c0_47] : memref<2x1x32xf32, #tpu.memory_space<vmem>>, vector<1x1x32xf32>
    %90 = vector.shape_cast %89 : vector<1x1x32xf32> to vector<1x32xf32>
    %91 = vector.broadcast %90 : vector<1x32xf32> to vector<16x32xf32>
    %92 = arith.addf %88, %91 : vector<16x32xf32>
    %cst_48 = arith.constant 0.000000e+00 : f32
    %93 = vector.broadcast %cst_48 : f32 to vector<16x32xf32>
    %94 = arith.maximumf %92, %93 : vector<16x32xf32>
    %c0_49 = arith.constant 0 : index
    %c0_50 = arith.constant 0 : index
    %c0_51 = arith.constant 0 : index
    %95 = vector.load %arg8[%c0_49, %c0_50, %c0_51] : memref<2x32x29xf32, #tpu.memory_space<vmem>>, vector<1x32x29xf32>
    %96 = vector.shape_cast %95 : vector<1x32x29xf32> to vector<32x29xf32>
    %cst_52 = arith.constant dense<0.000000e+00> : vector<16x29xf32>
    %97 = tpu.matmul %94, %96, %cst_52 {dimension_numbers = #tpu.dot_dimension_numbers<[1], [0], [0], [1], [0, 0, 1, 1], [], []>} : vector<16x32xf32>, vector<32x29xf32>, vector<16x29xf32> -> vector<16x29xf32>
    %c0_53 = arith.constant 0 : index
    %c0_54 = arith.constant 0 : index
    %c0_55 = arith.constant 0 : index
    %98 = vector.load %arg9[%c0_53, %c0_54, %c0_55] : memref<2x1x29xf32, #tpu.memory_space<vmem>>, vector<1x1x29xf32>
    %99 = vector.shape_cast %98 : vector<1x1x29xf32> to vector<1x29xf32>
    %100 = vector.broadcast %99 : vector<1x29xf32> to vector<16x29xf32>
    %101 = arith.addf %97, %100 : vector<16x29xf32>
    %102 = arith.addf %85, %101 : vector<16x29xf32>
    %c0_56 = arith.constant 0 : index
    %c0_57 = arith.constant 0 : index
    %c0_58 = arith.constant 0 : index
    %103 = vector.load %arg12[%c0_56, %c0_57, %c0_58] : memref<2x1x29xf32, #tpu.memory_space<vmem>>, vector<1x1x29xf32>
    %104 = vector.shape_cast %103 : vector<1x1x29xf32> to vector<1x29xf32>
    %c0_59 = arith.constant 0 : index
    %c0_60 = arith.constant 0 : index
    %c0_61 = arith.constant 0 : index
    %105 = vector.load %arg13[%c0_59, %c0_60, %c0_61] : memref<2x1x29xf32, #tpu.memory_space<vmem>>, vector<1x1x29xf32>
    %106 = vector.shape_cast %105 : vector<1x1x29xf32> to vector<1x29xf32>
    %cst_62 = arith.constant dense<0.000000e+00> : vector<16xf32>
    %107 = vector.multi_reduction <add>, %102, %cst_62 [1] : vector<16x29xf32> to vector<16xf32>
    %108 = vector.shape_cast %107 : vector<16xf32> to vector<16x1xf32>
    %cst_63 = arith.constant 2.900000e+01 : f32
    %109 = vector.broadcast %cst_63 : f32 to vector<16x1xf32>
    %110 = arith.divf %108, %109 : vector<16x1xf32>
    %111 = vector.broadcast %110 : vector<16x1xf32> to vector<16x29xf32>
    %112 = arith.subf %102, %111 : vector<16x29xf32>
    %113 = arith.mulf %112, %112 : vector<16x29xf32>
    %cst_64 = arith.constant dense<0.000000e+00> : vector<16xf32>
    %114 = vector.multi_reduction <add>, %113, %cst_64 [1] : vector<16x29xf32> to vector<16xf32>
    %115 = vector.shape_cast %114 : vector<16xf32> to vector<16x1xf32>
    %cst_65 = arith.constant 2.900000e+01 : f32
    %116 = vector.broadcast %cst_65 : f32 to vector<16x1xf32>
    %117 = arith.divf %115, %116 : vector<16x1xf32>
    %cst_66 = arith.constant 9.99999974E-6 : f32
    %118 = vector.broadcast %cst_66 : f32 to vector<16x1xf32>
    %119 = arith.addf %117, %118 : vector<16x1xf32>
    %120 = math.rsqrt %119 : vector<16x1xf32>
    %121 = vector.broadcast %120 : vector<16x1xf32> to vector<16x29xf32>
    %122 = arith.mulf %112, %121 : vector<16x29xf32>
    %123 = vector.broadcast %104 : vector<1x29xf32> to vector<16x29xf32>
    %124 = arith.mulf %122, %123 : vector<16x29xf32>
    %125 = vector.broadcast %106 : vector<1x29xf32> to vector<16x29xf32>
    %126 = arith.addf %124, %125 : vector<16x29xf32>
    %c1 = arith.constant 1 : index
    %c0_67 = arith.constant 0 : index
    %c0_68 = arith.constant 0 : index
    %127 = vector.load %arg2[%c1, %c0_67, %c0_68] : memref<2x29x87xf32, #tpu.memory_space<vmem>>, vector<1x29x87xf32>
    %128 = vector.shape_cast %127 : vector<1x29x87xf32> to vector<29x87xf32>
    %cst_69 = arith.constant dense<0.000000e+00> : vector<16x87xf32>
    %129 = tpu.matmul %126, %128, %cst_69 {dimension_numbers = #tpu.dot_dimension_numbers<[1], [0], [0], [1], [0, 0, 1, 1], [], []>} : vector<16x29xf32>, vector<29x87xf32>, vector<16x87xf32> -> vector<16x87xf32>
    %c1_70 = arith.constant 1 : index
    %c0_71 = arith.constant 0 : index
    %c0_72 = arith.constant 0 : index
    %130 = vector.load %arg3[%c1_70, %c0_71, %c0_72] : memref<2x1x87xf32, #tpu.memory_space<vmem>>, vector<1x1x87xf32>
    %131 = vector.shape_cast %130 : vector<1x1x87xf32> to vector<1x87xf32>
    %132 = vector.broadcast %131 : vector<1x87xf32> to vector<16x87xf32>
    %133 = arith.addf %129, %132 : vector<16x87xf32>
    %134 = vector.extract_strided_slice %133 {offsets = [0, 0], sizes = [8, 29], strides = [1, 1]} : vector<16x87xf32> to vector<8x29xf32>
    %cst_73 = arith.constant 0.185695335 : f32
    %135 = vector.broadcast %cst_73 : f32 to vector<8x29xf32>
    %136 = arith.mulf %134, %135 : vector<8x29xf32>
    %137 = vector.extract_strided_slice %133 {offsets = [0, 29], sizes = [8, 29], strides = [1, 1]} : vector<16x87xf32> to vector<8x29xf32>
    %138 = vector.extract_strided_slice %133 {offsets = [0, 58], sizes = [8, 29], strides = [1, 1]} : vector<16x87xf32> to vector<8x29xf32>
    %cst_74 = arith.constant dense<0.000000e+00> : vector<8x8xf32>
    %139 = tpu.matmul %136, %137, %cst_74 {dimension_numbers = #tpu.dot_dimension_numbers<[1], [1], [0], [0], [0, 0, 1, 0], [], []>} : vector<8x29xf32>, vector<8x29xf32>, vector<8x8xf32> -> vector<8x8xf32>
    %140 = arith.addf %139, %5 : vector<8x8xf32>
    %cst_75 = arith.constant dense<0xFF800000> : vector<8xf32>
    %141 = vector.multi_reduction <maximumf>, %140, %cst_75 [1] : vector<8x8xf32> to vector<8xf32>
    %142 = vector.shape_cast %141 : vector<8xf32> to vector<8x1xf32>
    %143 = vector.broadcast %142 : vector<8x1xf32> to vector<8x8xf32>
    %144 = arith.subf %140, %143 : vector<8x8xf32>
    %145 = math.exp %144 : vector<8x8xf32>
    %cst_76 = arith.constant dense<0.000000e+00> : vector<8xf32>
    %146 = vector.multi_reduction <add>, %145, %cst_76 [1] : vector<8x8xf32> to vector<8xf32>
    %147 = vector.shape_cast %146 : vector<8xf32> to vector<8x1xf32>
    %148 = tpu.reciprocal %147 : vector<8x1xf32> -> vector<8x1xf32>
    %149 = vector.broadcast %148 : vector<8x1xf32> to vector<8x8xf32>
    %150 = arith.mulf %145, %149 : vector<8x8xf32>
    %cst_77 = arith.constant dense<0.000000e+00> : vector<8x29xf32>
    %151 = tpu.matmul %150, %138, %cst_77 {dimension_numbers = #tpu.dot_dimension_numbers<[1], [0], [0], [1], [0, 0, 1, 1], [], []>} : vector<8x8xf32>, vector<8x29xf32>, vector<8x29xf32> -> vector<8x29xf32>
    %152 = vector.extract_strided_slice %133 {offsets = [8, 0], sizes = [8, 29], strides = [1, 1]} : vector<16x87xf32> to vector<8x29xf32>
    %cst_78 = arith.constant 0.185695335 : f32
    %153 = vector.broadcast %cst_78 : f32 to vector<8x29xf32>
    %154 = arith.mulf %152, %153 : vector<8x29xf32>
    %155 = vector.extract_strided_slice %133 {offsets = [8, 29], sizes = [8, 29], strides = [1, 1]} : vector<16x87xf32> to vector<8x29xf32>
    %156 = vector.extract_strided_slice %133 {offsets = [8, 58], sizes = [8, 29], strides = [1, 1]} : vector<16x87xf32> to vector<8x29xf32>
    %cst_79 = arith.constant dense<0.000000e+00> : vector<8x8xf32>
    %157 = tpu.matmul %154, %155, %cst_79 {dimension_numbers = #tpu.dot_dimension_numbers<[1], [1], [0], [0], [0, 0, 1, 0], [], []>} : vector<8x29xf32>, vector<8x29xf32>, vector<8x8xf32> -> vector<8x8xf32>
    %158 = arith.addf %157, %5 : vector<8x8xf32>
    %cst_80 = arith.constant dense<0xFF800000> : vector<8xf32>
    %159 = vector.multi_reduction <maximumf>, %158, %cst_80 [1] : vector<8x8xf32> to vector<8xf32>
    %160 = vector.shape_cast %159 : vector<8xf32> to vector<8x1xf32>
    %161 = vector.broadcast %160 : vector<8x1xf32> to vector<8x8xf32>
    %162 = arith.subf %158, %161 : vector<8x8xf32>
    %163 = math.exp %162 : vector<8x8xf32>
    %cst_81 = arith.constant dense<0.000000e+00> : vector<8xf32>
    %164 = vector.multi_reduction <add>, %163, %cst_81 [1] : vector<8x8xf32> to vector<8xf32>
    %165 = vector.shape_cast %164 : vector<8xf32> to vector<8x1xf32>
    %166 = tpu.reciprocal %165 : vector<8x1xf32> -> vector<8x1xf32>
    %167 = vector.broadcast %166 : vector<8x1xf32> to vector<8x8xf32>
    %168 = arith.mulf %163, %167 : vector<8x8xf32>
    %cst_82 = arith.constant dense<0.000000e+00> : vector<8x29xf32>
    %169 = tpu.matmul %168, %156, %cst_82 {dimension_numbers = #tpu.dot_dimension_numbers<[1], [0], [0], [1], [0, 0, 1, 1], [], []>} : vector<8x8xf32>, vector<8x29xf32>, vector<8x29xf32> -> vector<8x29xf32>
    %170 = tpu.concatenate %151, %169 in 0 : vector<8x29xf32>, vector<8x29xf32> -> vector<16x29xf32>
    %c1_83 = arith.constant 1 : index
    %c0_84 = arith.constant 0 : index
    %c0_85 = arith.constant 0 : index
    %171 = vector.load %arg4[%c1_83, %c0_84, %c0_85] : memref<2x29x29xf32, #tpu.memory_space<vmem>>, vector<1x29x29xf32>
    %172 = vector.shape_cast %171 : vector<1x29x29xf32> to vector<29x29xf32>
    %cst_86 = arith.constant dense<0.000000e+00> : vector<16x29xf32>
    %173 = tpu.matmul %170, %172, %cst_86 {dimension_numbers = #tpu.dot_dimension_numbers<[1], [0], [0], [1], [0, 0, 1, 1], [], []>} : vector<16x29xf32>, vector<29x29xf32>, vector<16x29xf32> -> vector<16x29xf32>
    %c1_87 = arith.constant 1 : index
    %c0_88 = arith.constant 0 : index
    %c0_89 = arith.constant 0 : index
    %174 = vector.load %arg5[%c1_87, %c0_88, %c0_89] : memref<2x1x29xf32, #tpu.memory_space<vmem>>, vector<1x1x29xf32>
    %175 = vector.shape_cast %174 : vector<1x1x29xf32> to vector<1x29xf32>
    %176 = vector.broadcast %175 : vector<1x29xf32> to vector<16x29xf32>
    %177 = arith.addf %173, %176 : vector<16x29xf32>
    %178 = arith.addf %126, %177 : vector<16x29xf32>
    %c1_90 = arith.constant 1 : index
    %c0_91 = arith.constant 0 : index
    %c0_92 = arith.constant 0 : index
    %179 = vector.load %arg10[%c1_90, %c0_91, %c0_92] : memref<2x1x29xf32, #tpu.memory_space<vmem>>, vector<1x1x29xf32>
    %180 = vector.shape_cast %179 : vector<1x1x29xf32> to vector<1x29xf32>
    %c1_93 = arith.constant 1 : index
    %c0_94 = arith.constant 0 : index
    %c0_95 = arith.constant 0 : index
    %181 = vector.load %arg11[%c1_93, %c0_94, %c0_95] : memref<2x1x29xf32, #tpu.memory_space<vmem>>, vector<1x1x29xf32>
    %182 = vector.shape_cast %181 : vector<1x1x29xf32> to vector<1x29xf32>
    %cst_96 = arith.constant dense<0.000000e+00> : vector<16xf32>
    %183 = vector.multi_reduction <add>, %178, %cst_96 [1] : vector<16x29xf32> to vector<16xf32>
    %184 = vector.shape_cast %183 : vector<16xf32> to vector<16x1xf32>
    %cst_97 = arith.constant 2.900000e+01 : f32
    %185 = vector.broadcast %cst_97 : f32 to vector<16x1xf32>
    %186 = arith.divf %184, %185 : vector<16x1xf32>
    %187 = vector.broadcast %186 : vector<16x1xf32> to vector<16x29xf32>
    %188 = arith.subf %178, %187 : vector<16x29xf32>
    %189 = arith.mulf %188, %188 : vector<16x29xf32>
    %cst_98 = arith.constant dense<0.000000e+00> : vector<16xf32>
    %190 = vector.multi_reduction <add>, %189, %cst_98 [1] : vector<16x29xf32> to vector<16xf32>
    %191 = vector.shape_cast %190 : vector<16xf32> to vector<16x1xf32>
    %cst_99 = arith.constant 2.900000e+01 : f32
    %192 = vector.broadcast %cst_99 : f32 to vector<16x1xf32>
    %193 = arith.divf %191, %192 : vector<16x1xf32>
    %cst_100 = arith.constant 9.99999974E-6 : f32
    %194 = vector.broadcast %cst_100 : f32 to vector<16x1xf32>
    %195 = arith.addf %193, %194 : vector<16x1xf32>
    %196 = math.rsqrt %195 : vector<16x1xf32>
    %197 = vector.broadcast %196 : vector<16x1xf32> to vector<16x29xf32>
    %198 = arith.mulf %188, %197 : vector<16x29xf32>
    %199 = vector.broadcast %180 : vector<1x29xf32> to vector<16x29xf32>
    %200 = arith.mulf %198, %199 : vector<16x29xf32>
    %201 = vector.broadcast %182 : vector<1x29xf32> to vector<16x29xf32>
    %202 = arith.addf %200, %201 : vector<16x29xf32>
    %c1_101 = arith.constant 1 : index
    %c0_102 = arith.constant 0 : index
    %c0_103 = arith.constant 0 : index
    %203 = vector.load %arg6[%c1_101, %c0_102, %c0_103] : memref<2x29x32xf32, #tpu.memory_space<vmem>>, vector<1x29x32xf32>
    %204 = vector.shape_cast %203 : vector<1x29x32xf32> to vector<29x32xf32>
    %cst_104 = arith.constant dense<0.000000e+00> : vector<16x32xf32>
    %205 = tpu.matmul %202, %204, %cst_104 {dimension_numbers = #tpu.dot_dimension_numbers<[1], [0], [0], [1], [0, 0, 1, 1], [], []>} : vector<16x29xf32>, vector<29x32xf32>, vector<16x32xf32> -> vector<16x32xf32>
    %c1_105 = arith.constant 1 : index
    %c0_106 = arith.constant 0 : index
    %c0_107 = arith.constant 0 : index
    %206 = vector.load %arg7[%c1_105, %c0_106, %c0_107] : memref<2x1x32xf32, #tpu.memory_space<vmem>>, vector<1x1x32xf32>
    %207 = vector.shape_cast %206 : vector<1x1x32xf32> to vector<1x32xf32>
    %208 = vector.broadcast %207 : vector<1x32xf32> to vector<16x32xf32>
    %209 = arith.addf %205, %208 : vector<16x32xf32>
    %cst_108 = arith.constant 0.000000e+00 : f32
    %210 = vector.broadcast %cst_108 : f32 to vector<16x32xf32>
    %211 = arith.maximumf %209, %210 : vector<16x32xf32>
    %c1_109 = arith.constant 1 : index
    %c0_110 = arith.constant 0 : index
    %c0_111 = arith.constant 0 : index
    %212 = vector.load %arg8[%c1_109, %c0_110, %c0_111] : memref<2x32x29xf32, #tpu.memory_space<vmem>>, vector<1x32x29xf32>
    %213 = vector.shape_cast %212 : vector<1x32x29xf32> to vector<32x29xf32>
    %cst_112 = arith.constant dense<0.000000e+00> : vector<16x29xf32>
    %214 = tpu.matmul %211, %213, %cst_112 {dimension_numbers = #tpu.dot_dimension_numbers<[1], [0], [0], [1], [0, 0, 1, 1], [], []>} : vector<16x32xf32>, vector<32x29xf32>, vector<16x29xf32> -> vector<16x29xf32>
    %c1_113 = arith.constant 1 : index
    %c0_114 = arith.constant 0 : index
    %c0_115 = arith.constant 0 : index
    %215 = vector.load %arg9[%c1_113, %c0_114, %c0_115] : memref<2x1x29xf32, #tpu.memory_space<vmem>>, vector<1x1x29xf32>
    %216 = vector.shape_cast %215 : vector<1x1x29xf32> to vector<1x29xf32>
    %217 = vector.broadcast %216 : vector<1x29xf32> to vector<16x29xf32>
    %218 = arith.addf %214, %217 : vector<16x29xf32>
    %219 = arith.addf %202, %218 : vector<16x29xf32>
    %c1_116 = arith.constant 1 : index
    %c0_117 = arith.constant 0 : index
    %c0_118 = arith.constant 0 : index
    %220 = vector.load %arg12[%c1_116, %c0_117, %c0_118] : memref<2x1x29xf32, #tpu.memory_space<vmem>>, vector<1x1x29xf32>
    %221 = vector.shape_cast %220 : vector<1x1x29xf32> to vector<1x29xf32>
    %c1_119 = arith.constant 1 : index
    %c0_120 = arith.constant 0 : index
    %c0_121 = arith.constant 0 : index
    %222 = vector.load %arg13[%c1_119, %c0_120, %c0_121] : memref<2x1x29xf32, #tpu.memory_space<vmem>>, vector<1x1x29xf32>
    %223 = vector.shape_cast %222 : vector<1x1x29xf32> to vector<1x29xf32>
    %cst_122 = arith.constant dense<0.000000e+00> : vector<16xf32>
    %224 = vector.multi_reduction <add>, %219, %cst_122 [1] : vector<16x29xf32> to vector<16xf32>
    %225 = vector.shape_cast %224 : vector<16xf32> to vector<16x1xf32>
    %cst_123 = arith.constant 2.900000e+01 : f32
    %226 = vector.broadcast %cst_123 : f32 to vector<16x1xf32>
    %227 = arith.divf %225, %226 : vector<16x1xf32>
    %228 = vector.broadcast %227 : vector<16x1xf32> to vector<16x29xf32>
    %229 = arith.subf %219, %228 : vector<16x29xf32>
    %230 = arith.mulf %229, %229 : vector<16x29xf32>
    %cst_124 = arith.constant dense<0.000000e+00> : vector<16xf32>
    %231 = vector.multi_reduction <add>, %230, %cst_124 [1] : vector<16x29xf32> to vector<16xf32>
    %232 = vector.shape_cast %231 : vector<16xf32> to vector<16x1xf32>
    %cst_125 = arith.constant 2.900000e+01 : f32
    %233 = vector.broadcast %cst_125 : f32 to vector<16x1xf32>
    %234 = arith.divf %232, %233 : vector<16x1xf32>
    %cst_126 = arith.constant 9.99999974E-6 : f32
    %235 = vector.broadcast %cst_126 : f32 to vector<16x1xf32>
    %236 = arith.addf %234, %235 : vector<16x1xf32>
    %237 = math.rsqrt %236 : vector<16x1xf32>
    %238 = vector.broadcast %237 : vector<16x1xf32> to vector<16x29xf32>
    %239 = arith.mulf %229, %238 : vector<16x29xf32>
    %240 = vector.broadcast %221 : vector<1x29xf32> to vector<16x29xf32>
    %241 = arith.mulf %239, %240 : vector<16x29xf32>
    %242 = vector.broadcast %223 : vector<1x29xf32> to vector<16x29xf32>
    %243 = arith.addf %241, %242 : vector<16x29xf32>
    %244 = vector.extract_strided_slice %243 {offsets = [7, 0], sizes = [1, 29], strides = [1, 1]} : vector<16x29xf32> to vector<1x29xf32>
    %245 = vector.extract_strided_slice %243 {offsets = [15, 0], sizes = [1, 29], strides = [1, 1]} : vector<16x29xf32> to vector<1x29xf32>
    %246 = tpu.concatenate %244, %245 in 0 : vector<1x29xf32>, vector<1x29xf32> -> vector<2x29xf32>
    %c0_127 = arith.constant 0 : index
    %c0_128 = arith.constant 0 : index
    %247 = vector.load %arg14[%c0_127, %c0_128] : memref<29x16xf32, #tpu.memory_space<vmem>>, vector<29x16xf32>
    %cst_129 = arith.constant dense<0.000000e+00> : vector<2x16xf32>
    %248 = tpu.matmul %246, %247, %cst_129 {dimension_numbers = #tpu.dot_dimension_numbers<[1], [0], [0], [1], [0, 0, 1, 1], [], []>} : vector<2x29xf32>, vector<29x16xf32>, vector<2x16xf32> -> vector<2x16xf32>
    %c0_130 = arith.constant 0 : index
    %c0_131 = arith.constant 0 : index
    %249 = vector.load %arg15[%c0_130, %c0_131] : memref<1x16xf32, #tpu.memory_space<vmem>>, vector<1x16xf32>
    %250 = vector.broadcast %249 : vector<1x16xf32> to vector<2x16xf32>
    %251 = arith.addf %248, %250 : vector<2x16xf32>
    %c0_132 = arith.constant 0 : index
    %c0_133 = arith.constant 0 : index
    %252 = vector.load %arg16[%c0_132, %c0_133] : memref<2x16xf32, #tpu.memory_space<vmem>>, vector<2x16xf32>
    tpu.vector_store %arg16[%c0_132, %c0_133], %251 {strides = array<i32>} : memref<2x16xf32, #tpu.memory_space<vmem>>, vector<2x16xf32>,
    return
  }
}

</mosaic_0001>

<bundles_post_ra>
// kernel: forward.1
= control target key start
LH: loop header
LB: loop body
LE: loop exit
PB: predicated region body
PF: predicated region fallthrough
CT: control target
= control target key end

     0   :  { %s1552_s0 = inlined_call_operand.vmem [shape: f32[16,29], index: 0, kind: input, shape index: {}]   ;;  %s1553_s1 = inlined_call_operand.vmem [shape: f32[16,29], index: 1, kind: input, shape index: {}]   ;;  %s1554_s2 = inlined_call_operand.vmem [shape: f32[2,29,87], index: 2, kind: input, shape index: {}]   ;;  %s1555_s3 = inlined_call_operand.vmem [shape: f32[2,1,87], index: 3, kind: input, shape index: {}]   ;;  %s1556_s4 = inlined_call_operand.vmem [shape: f32[2,29,29], index: 4, kind: input, shape index: {}]   ;;  %s1557_s5 = inlined_call_operand.vmem [shape: f32[2,1,29], index: 5, kind: input, shape index: {}]   ;;  %s1558_s6 = inlined_call_operand.vmem [shape: f32[2,29,32], index: 6, kind: input, shape index: {}]   ;;  %s1559_s7 = inlined_call_operand.vmem [shape: f32[2,1,32], index: 7, kind: input, shape index: {}]   ;;  %s1560_s8 = inlined_call_operand.vmem [shape: f32[2,32,29], index: 8, kind: input, shape index: {}]   ;;  %s1561_s9 = inlined_call_operand.vmem [shape: f32[2,1,29], index: 9, kind: input, shape index: {}]   ;;  %s1562_s10 = inlined_call_operand.vmem [shape: f32[2,1,29], index: 10, kind: input, shape index: {}]   ;;  %s1563_s11 = inlined_call_operand.vmem [shape: f32[2,1,29], index: 11, kind: input, shape index: {}]   ;;  %s1564_s12 = inlined_call_operand.vmem [shape: f32[2,1,29], index: 12, kind: input, shape index: {}]   ;;  %s1565_s13 = inlined_call_operand.vmem [shape: f32[2,1,29], index: 13, kind: input, shape index: {}]   ;;  %s1566_s14 = inlined_call_operand.vmem [shape: f32[29,16], index: 14, kind: input, shape index: {}]   ;;  %s1567_s15 = inlined_call_operand.vmem [shape: f32[1,16], index: 15, kind: input, shape index: {}]   ;;  %s1568_s16 = inlined_call_operand.hbm [shape: f32[2,16], index: 16, kind: output, shape index: {0}]   ;;  %s1569_s17 = inlined_call_operand.vmem [shape: f32[16,29], index: 17, kind: output, shape index: {1}]  }
   0x1   :  { %1572 = sst [smem:[#allocation5_spill]] %s1552_s0 }
   0x2   :  { %1573 = sst [smem:[#allocation6_spill]] %s1553_s1 }
   0x3   :  { %v74_v0 = vld [vmem:[%s1554_s2 + $0x18] sm:$0x1f]  ;;  %vm85_vm0 = vcmask 1044480   ;;  %v73_v1 = vld [vmem:[%s1554_s2 + $0x10] sm:$0xff]  ;;  %v72_v2 = vld [vmem:[%s1554_s2 + $0x8] sm:$0xff]  ;;  %s1574_s18 = sld [smem:[#allocation5_spill]] }
   0x4   :  { %1023 = vmatpush.msk.msra.mxu0 %vm85_vm0, %v74_v0  ;;  %s1575_s20 = sld [smem:[#allocation6_spill]]  ;;  %vm68_vm1 = vcmask 236544   ;;  %v71_v9 = vld [vmem:[%s1554_s2] sm:$0xff] }
   0x6   :  { %102 = vmatpush.msra.mxu0 %v73_v1 }
   0x8   :  { %103 = vmatpush.msra.mxu0 %v72_v2 }
   0x9   :  { %v62_v3 = vld [vmem:[%s1574_s18] sm:$0xff]  ;;  %v63_v6 = vld [vmem:[%s1574_s18 + $0x8] sm:$0xff] }
   0xa   :  { %v64_v4 = vld [vmem:[%s1575_s20] sm:$0xff]  ;;  %v65_v7 = vld [vmem:[%s1575_s20 + $0x8] sm:$0xff]  ;;  %104 = vmatpush.msra.mxu0 %v71_v9 }
   0xb   :  { %v1276_v5 = vadd.f32 %v64_v4, %v62_v3  ;;  %v1284_v8 = vadd.f32 %v65_v7, %v63_v6 }
   0xd   :  { %69 = vst.msk [vmem:[%s1569_s17] sm:$0xff] %vm68_vm1, %v1276_v5  ;;  %1024 = vmatmul.msk.f32.vlgmr.msra.gmra.mxu0 %vm68_vm1, %v1276_v5 }
   0xe   :  { %70 = vst.msk [vmem:[%s1569_s17 + $0x8] sm:$0xff] %vm68_vm1, %v1284_v8 }
   0xf   :  { %23 = vsyncpa [#allocation3], 0  ;;  %v1088_v10 = vld [vmem:[%s1555_s3] ss:$0 sm:$0xff]  ;;  %s1165_s19 = smov 99   ;;  %s1166_s17 = smov 70   ;;  %v56_v20 = vlaneseq }
  0x10   :  { %v1167_v23 = vmov -inf   ;;  %vm141_vm3 = vcmask 64512   ;;  %v274_v43 = vld [vmem:[%s1556_s4 + $0x18] sm:$0x1f]  ;;  %v273_v44 = vld [vmem:[%s1556_s4 + $0x10] sm:$0xff]  ;;  %v272_v45 = vld [vmem:[%s1556_s4 + $0x8] sm:$0xff] }
  0x11   :  { %v57_v21 = vshrl.u32 %v56_v20, 7  ;;  %v59_v22 = vand.u32 127, %v56_v20  ;;  %v271_v6 = vld [vmem:[%s1556_s4] sm:$0xff] }
  0x13   :  { %vm60_vm2 = vcmp.le.s32.totalorder %v59_v22, %v57_v21 }
  0x14   :  { %v1313_v24 = vsel %vm60_vm2, 0.0, %v1167_v23 }
  0x15   :  { %1025 = vmatmul.msk.f32.gmra.mxu0 %vm68_vm1, %v1284_v8 }
  0x8a   :  { %v106_v11 = vpop.f32.mrf.mxu0 }
  0x8b   :  { %v107_v12 = vadd.f32 %v1088_v10, %v106_v11 }
  0x8d   :  { %114 = vrot.lane.b32.xlu0 %v107_v12, %s1165_s19  ;;  %v112_v16 = vmul.f32 0.18569534, %v107_v12 }
  0x92   :  { %v109_v13 = vpop.f32.mrf.mxu0 }
  0x93   :  { %v110_v14 = vadd.f32 %v1088_v10, %v109_v13  ;;  %v1089_v10 = vld [vmem:[%s1557_s5] ss:$0 sm:$0xff] }
  0x95   :  { %194 = vrot.lane.b32.xlu0 %v110_v14, %s1165_s19  ;;  %v192_v18 = vmul.f32 0.18569534, %v110_v14 }
  0x9d   :  { %166 = vrot.lane.b32.xlu0 %v107_v12, %s1166_s17 }
  0xff   :  { %v115_v15 = vpop.permute.xlu0 %114 }
 0x100   :  { %1026 = vmatpush.xpose.msk.msra.mxu1 %vm68_vm1, %v115_v15 }
 0x103   :  { %1027 = vmatmul.msk.f32.vlgmr.msra.gmra.mxu1 %vm68_vm1, %v112_v16 }
 0x104   :  { %1032 = vmatpush.msk.msrb.mxu1 %vm85_vm0, %v274_v43  ;;  %v421_v43 = vld [vmem:[%s1560_s8 + $0x18] sm:$0xff] }
 0x106   :  { %301 = vmatpush.msrb.mxu1 %v273_v44 }
 0x107   :  { %v195_v17 = vpop.permute.xlu0 %194 }
 0x108   :  { %1029 = vmatpush.xpose.msk.msra.mxu3 %vm68_vm1, %v195_v17  ;;  %302 = vmatpush.msrb.mxu1 %v272_v45 }
 0x10a   :  { %303 = vmatpush.msrb.mxu1 %v271_v6  ;;  %v419_v6 = vld [vmem:[%s1560_s8 + $0x8] sm:$0xff] }
 0x10b   :  { %1030 = vmatmul.msk.f32.vlgmr.msra.gmra.mxu3 %vm68_vm1, %v192_v18 }
 0x10f   :  { %v167_v19 = vpop.permute.xlu0 %166 }
 0x110   :  { %187 = vmatpush.msra.mxu2 %v167_v19  ;;  %v1168_v19 = vmov 29.0  }
 0x180   :  { %v138_v25 = vpop.f32.mrf.mxu1 }
 0x181   :  { %v139_v26 = vadd.f32 %v138_v25, %v1313_v24 }
 0x183   :  { %v142_v27 = vsel %vm141_vm3, %v139_v26, -inf }
 0x184   :  { %143 = vmax.xlane.f32.xlu1 %v142_v27 }
 0x18e   :  { %v218_v28 = vpop.f32.mrf.mxu3 }
 0x18f   :  { %v219_v29 = vadd.f32 %v218_v28, %v1313_v24 }
 0x191   :  { %v221_v30 = vsel %vm141_vm3, %v219_v29, -inf }
 0x192   :  { %222 = vmax.xlane.f32.xlu1 %v221_v30 }
 0x1ab   :  { %245 = vrot.lane.b32.xlu1 %v110_v14, %s1166_s17 }
 0x1f7   :  { %v144_v31 = vpop.xlane.xlu1 %143 }
 0x1f8   :  { %v145_v32 = vsub.f32 %v139_v26, %v144_v31 }
 0x1fa   :  { %v146_v33 = vmul.f32 1.442695, %v145_v32 }
 0x1fc   :  { %1105 = vpow2.f32 %v146_v33 }
 0x202   :  { %v1106_v34 = vpop.eup %1105 }
 0x203   :  { %v148_v35 = vsel %vm141_vm3, %v1106_v34, 0.0 }
 0x204   :  { %149 = vadd.xlane.f32.xlu2 %v148_v35  ;;  %v379_v35 = vld [vmem:[%s1558_s6 + $0x18] sm:$0x1f] }
 0x205   :  { %v223_v36 = vpop.xlane.xlu1 %222  ;;  %1035 = vmatpush.msk.msrb.mxu3 %vm85_vm0, %v379_v35  ;;  %v1043_v35 = vld [vmem:[%s1554_s2 + $0x38] sm:$0x1f] }
 0x206   :  { %v224_v37 = vsub.f32 %v219_v29, %v223_v36  ;;  %v378_v36 = vld [vmem:[%s1558_s6 + $0x10] sm:$0xff]  ;;  %1045 = vmatpush.msk.msrb.mxu0 %vm85_vm0, %v1043_v35 }
 0x207   :  { %406 = vmatpush.msrb.mxu3 %v378_v36  ;;  %v1042_v36 = vld [vmem:[%s1554_s2 + $0x30] sm:$0xff] }
 0x208   :  { %v225_v38 = vmul.f32 1.442695, %v224_v37  ;;  %v377_v37 = vld [vmem:[%s1558_s6 + $0x8] sm:$0xff]  ;;  %546 = vmatpush.msrb.mxu0 %v1042_v36 }
 0x209   :  { %407 = vmatpush.msrb.mxu3 %v377_v37  ;;  %v1041_v37 = vld [vmem:[%s1554_s2 + $0x28] sm:$0xff] }
 0x20a   :  { %1107 = vpow2.f32 %v225_v38  ;;  %v376_v38 = vld [vmem:[%s1558_s6] sm:$0xff]  ;;  %547 = vmatpush.msrb.mxu0 %v1041_v37 }
 0x20b   :  { %408 = vmatpush.msrb.mxu3 %v376_v38  ;;  %v1040_v38 = vld [vmem:[%s1554_s2 + $0x20] sm:$0xff] }
 0x20c   :  { %548 = vmatpush.msrb.mxu0 %v1040_v38 }
 0x210   :  { %v1108_v39 = vpop.eup %1107 }
 0x211   :  { %v227_v40 = vsel %vm141_vm3, %v1108_v39, 0.0 }
 0x212   :  { %228 = vadd.xlane.f32.xlu2 %v227_v40 }
 0x21d   :  { %v246_v41 = vpop.permute.xlu1 %245 }
 0x21e   :  { %266 = vmatpush.msrb.mxu2 %v246_v41 }
 0x277   :  { %v150_v42 = vpop.xlane.xlu2 %149 }
 0x278   :  { %1109 = vrcp.f32 %v150_v42  ;;  %v162_v49 = vand.u32 2147483648, %v150_v42  ;;  %v160_v51 = vand.u32 2147483647, %v150_v42  ;;  %vm156_vm5 = vweird.f32 %v150_v42 }
 0x27a   :  { %v163_v54 = vor.u32 1.1754944e-38, %v162_v49  ;;  %vm161_vm7 = vcmp.eq.f32.partialorder %v160_v51, 8.507059e+37 }
 0x27e   :  { %v1110_v46 = vpop.eup %1109 }
 0x27f   :  { %v152_v47 = vmul.f32 %v1110_v46, %v150_v42  ;;  %vm157_vm4 = vweird.f32 %v1110_v46 }
 0x280   :  { %vm158_vm6 = vmor %vm156_vm5, %vm157_vm4 }
 0x281   :  { %v153_v48 = vsub.f32 1.0, %v152_v47 }
 0x283   :  { %v154_v50 = vmul.f32 %v1110_v46, %v153_v48 }
 0x285   :  { %v229_v52 = vpop.xlane.xlu2 %228  ;;  %v155_v53 = vadd.f32 %v1110_v46, %v154_v50 }
 0x286   :  { %1111 = vrcp.f32 %v229_v52  ;;  %v241_v61 = vand.u32 2147483648, %v229_v52  ;;  %v239_v63 = vand.u32 2147483647, %v229_v52  ;;  %vm235_vm9 = vweird.f32 %v229_v52 }
 0x287   :  { %v159_v55 = vsel %vm158_vm6, %v1110_v46, %v155_v53  ;;  %1113 = vrcp.f32 %v1168_v19  ;;  %vm426_vm6 = vcmask 261120  }
 0x288   :  { %v164_v56 = vsel %vm161_vm7, %v163_v54, %v159_v55  ;;  %v242_v1 = vor.u32 1.1754944e-38, %v241_v61  ;;  %vm240_vm11 = vcmp.eq.f32.partialorder %v239_v63, 8.507059e+37  ;;  %v1091_v55 = vld [vmem:[%s1563_s11] ss:$0 sm:$0xff] }
 0x289   :  { %v165_v57 = vmul.f32 %v1106_v34, %v164_v56 }
 0x28b   :  { %1028 = vmatmul.msk.f32.vlgmr.msra.gmra.mxu2 %vm141_vm3, %v165_v57 }
 0x28c   :  { %v1112_v58 = vpop.eup %1111  ;;  %445 = vmatpush.msra.mxu2 %v421_v43 }
 0x28d   :  { %v231_v59 = vmul.f32 %v1112_v58, %v229_v52  ;;  %vm236_vm8 = vweird.f32 %v1112_v58  ;;  %v1114_v20 = vpop.eup %1113  ;;  %v1090_v52 = vld [vmem:[%s1562_s10] ss:$0 sm:$0xff] }
 0x28e   :  { %vm237_vm10 = vmor %vm235_vm9, %vm236_vm8  ;;  %v322_v21 = vmul.f32 29.0, %v1114_v20  ;;  %vm326_vm12 = vweird.f32 %v1114_v20 }
 0x28f   :  { %v232_v60 = vsub.f32 1.0, %v231_v59 }
 0x290   :  { %v323_v22 = vsub.f32 1.0, %v322_v21 }
 0x291   :  { %v233_v62 = vmul.f32 %v1112_v58, %v232_v60 }
 0x292   :  { %v324_v23 = vmul.f32 %v1114_v20, %v323_v22 }
 0x293   :  { %v234_v0 = vadd.f32 %v1112_v58, %v233_v62 }
 0x294   :  { %v325_v25 = vadd.f32 %v1114_v20, %v324_v23 }
 0x295   :  { %v238_v2 = vsel %vm237_vm10, %v1112_v58, %v234_v0 }
 0x296   :  { %v243_v3 = vsel %vm240_vm11, %v242_v1, %v238_v2  ;;  %v1346_v26 = vsel %vm326_vm12, %v1114_v20, %v325_v25 }
 0x297   :  { %v244_v4 = vmul.f32 %v1108_v39, %v243_v3 }
 0x299   :  { %1031 = vmatmul.msk.f32.vlgmr.msrb.gmra.mxu2 %vm141_vm3, %v244_v4  ;;  %v420_v4 = vld [vmem:[%s1560_s8 + $0x10] sm:$0xff] }
 0x29a   :  { %446 = vmatpush.msra.mxu2 %v420_v4 }
 0x29c   :  { %447 = vmatpush.msra.mxu2 %v419_v6 }
 0x30e   :  { %v189_v7 = vpop.f32.mrf.mxu2 }
 0x30f   :  { %1033 = vmatmul.msk.f32.vlgmr.msrb.gmra.mxu1 %vm68_vm1, %v189_v7  ;;  %v418_v7 = vld [vmem:[%s1560_s8] sm:$0xff] }
 0x310   :  { %448 = vmatpush.msra.mxu2 %v418_v7 }
 0x31c   :  { %v268_v9 = vpop.f32.mrf.mxu2 }
 0x31d   :  { %1034 = vmatmul.msk.f32.gmra.mxu1 %vm68_vm1, %v268_v9  ;;  %v1092_v9 = vld [vmem:[%s1559_s7] ss:$0 sm:$0xff] }
 0x38c   :  { %v305_v11 = vpop.f32.mrf.mxu1 }
 0x38d   :  { %v306_v12 = vadd.f32 %v1089_v10, %v305_v11 }
 0x38f   :  { %v311_v13 = vadd.f32 %v306_v12, %v1276_v5 }
 0x391   :  { %v315_v14 = vsel %vm68_vm1, %v311_v13, 0.0 }
 0x392   :  { %316 = vadd.xlane.f32.xlu2 %v315_v14 }
 0x39a   :  { %v308_v15 = vpop.f32.mrf.mxu1 }
 0x39b   :  { %v309_v16 = vadd.f32 %v1089_v10, %v308_v15 }
 0x39d   :  { %v312_v17 = vadd.f32 %v309_v16, %v1284_v8  ;;  %v1093_v16 = vld [vmem:[%s1561_s9] ss:$0 sm:$0xff] }
 0x39f   :  { %v318_v18 = vsel %vm68_vm1, %v312_v17, 0.0 }
 0x3a0   :  { %319 = vadd.xlane.f32.xlu0 %v318_v18 }
 0x405   :  { %v317_v5 = vpop.xlane.xlu2 %316 }
 0x406   :  { %v328_v27 = vmul.f32 %v1346_v26, %v317_v5 }
 0x408   :  { %v330_v28 = vsub.f32 %v311_v13, %v328_v27 }
 0x40a   :  { %v332_v29 = vmul.f32 %v330_v28, %v330_v28 }
 0x40c   :  { %v334_v8 = vsel %vm68_vm1, %v332_v29, 0.0 }
 0x40d   :  { %335 = vadd.xlane.f32.xlu2 %v334_v8 }
 0x413   :  { %v320_v30 = vpop.xlane.xlu0 %319 }
 0x414   :  { %v329_v31 = vmul.f32 %v1346_v26, %v320_v30 }
 0x416   :  { %v331_v32 = vsub.f32 %v312_v17, %v329_v31 }
 0x418   :  { %v333_v33 = vmul.f32 %v331_v32, %v331_v32 }
 0x41a   :  { %v337_v34 = vsel %vm68_vm1, %v333_v33, 0.0 }
 0x41b   :  { %338 = vadd.xlane.f32.xlu2 %v337_v34 }
 0x480   :  { %v336_v39 = vpop.xlane.xlu2 %335 }
 0x481   :  { %v340_v40 = vmul.f32 %v336_v39, %v1346_v26 }
 0x483   :  { %v342_v41 = vadd.f32 1e-05, %v340_v40 }
 0x485   :  { %1115 = vrsqrt.f32 %v342_v41  ;;  %vm350_vm14 = vweird.f32 %v342_v41 }
 0x48b   :  { %v1116_v42 = vpop.eup %1115 }
 0x48c   :  { %v345_v44 = vmul.f32 %v1116_v42, %v342_v41  ;;  %vm351_vm13 = vweird.f32 %v1116_v42 }
 0x48d   :  { %vm352_vm15 = vmor %vm350_vm14, %vm351_vm13 }
 0x48e   :  { %v346_v45 = vmul.f32 %v1116_v42, %v345_v44  ;;  %v339_v46 = vpop.xlane.xlu2 %338 }
 0x48f   :  { %v341_v47 = vmul.f32 %v339_v46, %v1346_v26 }
 0x490   :  { %v347_v48 = vmul.f32 0.5, %v346_v45 }
 0x491   :  { %v343_v49 = vadd.f32 1e-05, %v341_v47 }
 0x492   :  { %v348_v50 = vsub.f32 1.5, %v347_v48 }
 0x493   :  { %1117 = vrsqrt.f32 %v343_v49  ;;  %vm360_vm4 = vweird.f32 %v343_v49 }
 0x494   :  { %v349_v51 = vmul.f32 %v1116_v42, %v348_v50 }
 0x496   :  { %v353_v53 = vsel %vm352_vm15, %v1116_v42, %v349_v51  ;;  %v1094_v51 = vld [vmem:[%s1564_s12] ss:$0 sm:$0xff] }
 0x497   :  { %v364_v54 = vmul.f32 %v353_v53, %v330_v28 }
 0x499   :  { %v1118_v56 = vpop.eup %1117  ;;  %v369_v57 = vmul.f32 %v1090_v52, %v364_v54  ;;  %v1095_v54 = vld [vmem:[%s1565_s13] ss:$0 sm:$0xff] }
 0x49a   :  { %v355_v58 = vmul.f32 %v1118_v56, %v343_v49  ;;  %vm361_vm2 = vweird.f32 %v1118_v56 }
 0x49b   :  { %v374_v59 = vadd.f32 %v1091_v55, %v369_v57  ;;  %vm362_vm5 = vmor %vm360_vm4, %vm361_vm2 }
 0x49c   :  { %v356_v60 = vmul.f32 %v1118_v56, %v355_v58 }
 0x49d   :  { %1036 = vmatmul.msk.f32.vlgmr.msrb.gmra.mxu3 %vm68_vm1, %v374_v59 }
 0x49e   :  { %v357_v61 = vmul.f32 0.5, %v356_v60 }
 0x4a0   :  { %v358_v62 = vsub.f32 1.5, %v357_v61 }
 0x4a2   :  { %v359_v63 = vmul.f32 %v1118_v56, %v358_v62 }
 0x4a4   :  { %v363_v0 = vsel %vm362_vm5, %v1118_v56, %v359_v63 }
 0x4a5   :  { %v365_v1 = vmul.f32 %v363_v0, %v331_v32 }
 0x4a7   :  { %v370_v2 = vmul.f32 %v1090_v52, %v365_v1 }
 0x4a9   :  { %v375_v3 = vadd.f32 %v1091_v55, %v370_v2 }
 0x4ab   :  { %1037 = vmatmul.msk.f32.gmra.mxu3 %vm68_vm1, %v375_v3 }
 0x520   :  { %v410_v10 = vpop.f32.mrf.mxu3 }
 0x521   :  { %v411_v11 = vadd.f32 %v1092_v9, %v410_v10 }
 0x523   :  { %v416_v12 = vmax.f32 %v411_v11, 0.0 }
 0x525   :  { %1038 = vmatmul.msk.f32.vlgmr.msra.gmra.mxu2 %vm426_vm6, %v416_v12 }
 0x52e   :  { %v413_v13 = vpop.f32.mrf.mxu3 }
 0x52f   :  { %v414_v14 = vadd.f32 %v1092_v9, %v413_v13 }
 0x531   :  { %v417_v15 = vmax.f32 %v414_v14, 0.0 }
 0x533   :  { %1039 = vmatmul.msk.f32.gmra.mxu2 %vm426_vm6, %v417_v15 }
 0x5a8   :  { %v450_v17 = vpop.f32.mrf.mxu2 }
 0x5a9   :  { %v451_v18 = vadd.f32 %v1093_v16, %v450_v17 }
 0x5ab   :  { %v456_v19 = vadd.f32 %v451_v18, %v374_v59 }
 0x5ad   :  { %v460_v20 = vsel %vm68_vm1, %v456_v19, 0.0 }
 0x5ae   :  { %461 = vadd.xlane.f32.xlu2 %v460_v20 }
 0x5b6   :  { %v453_v21 = vpop.f32.mrf.mxu2 }
 0x5b7   :  { %v454_v22 = vadd.f32 %v1093_v16, %v453_v21 }
 0x5b9   :  { %v457_v23 = vadd.f32 %v454_v22, %v375_v3  ;;  %v1096_v3 = vld [vmem:[%s1555_s3 + $0x1] ss:$0 sm:$0xff] }
 0x5bb   :  { %v463_v25 = vsel %vm68_vm1, %v457_v23, 0.0 }
 0x5bc   :  { %464 = vadd.xlane.f32.xlu1 %v463_v25 }
 0x621   :  { %v462_v5 = vpop.xlane.xlu2 %461 }
 0x622   :  { %v466_v27 = vmul.f32 %v462_v5, %v1346_v26 }
 0x624   :  { %v468_v28 = vsub.f32 %v456_v19, %v466_v27 }
 0x626   :  { %v470_v29 = vmul.f32 %v468_v28, %v468_v28 }
 0x628   :  { %v472_v8 = vsel %vm68_vm1, %v470_v29, 0.0 }
 0x629   :  { %473 = vadd.xlane.f32.xlu2 %v472_v8 }
 0x62f   :  { %v465_v30 = vpop.xlane.xlu1 %464 }
 0x630   :  { %v467_v31 = vmul.f32 %v465_v30, %v1346_v26 }
 0x632   :  { %v469_v32 = vsub.f32 %v457_v23, %v467_v31 }
 0x634   :  { %v471_v33 = vmul.f32 %v469_v32, %v469_v32 }
 0x636   :  { %v475_v34 = vsel %vm68_vm1, %v471_v33, 0.0 }
 0x637   :  { %476 = vadd.xlane.f32.xlu2 %v475_v34 }
 0x69c   :  { %v474_v39 = vpop.xlane.xlu2 %473 }
 0x69d   :  { %v478_v40 = vmul.f32 %v474_v39, %v1346_v26 }
 0x69f   :  { %v480_v41 = vadd.f32 1e-05, %v478_v40 }
 0x6a1   :  { %1119 = vrsqrt.f32 %v480_v41  ;;  %vm488_vm8 = vweird.f32 %v480_v41 }
 0x6a7   :  { %v1120_v42 = vpop.eup %1119 }
 0x6a8   :  { %v483_v43 = vmul.f32 %v1120_v42, %v480_v41  ;;  %vm489_vm7 = vweird.f32 %v1120_v42 }
 0x6a9   :  { %vm490_vm9 = vmor %vm488_vm8, %vm489_vm7 }
 0x6aa   :  { %v484_v44 = vmul.f32 %v1120_v42, %v483_v43  ;;  %v477_v45 = vpop.xlane.xlu2 %476  ;;  %v1056_v43 = vld [vmem:[%s1556_s4 + $0x30] sm:$0xff] }
 0x6ab   :  { %v479_v46 = vmul.f32 %v477_v45, %v1346_v26 }
 0x6ac   :  { %v485_v47 = vmul.f32 0.5, %v484_v44  ;;  %v1055_v44 = vld [vmem:[%s1556_s4 + $0x28] sm:$0xff] }
 0x6ad   :  { %v481_v48 = vadd.f32 1e-05, %v479_v46 }
 0x6ae   :  { %v486_v49 = vsub.f32 1.5, %v485_v47 }
 0x6af   :  { %1121 = vrsqrt.f32 %v481_v48  ;;  %vm498_vm11 = vweird.f32 %v481_v48 }
 0x6b0   :  { %v487_v50 = vmul.f32 %v1120_v42, %v486_v49 }
 0x6b2   :  { %v491_v52 = vsel %vm490_vm9, %v1120_v42, %v487_v50  ;;  %v1057_v42 = vld [vmem:[%s1556_s4 + $0x38] sm:$0x1f] }
 0x6b3   :  { %v502_v53 = vmul.f32 %v491_v52, %v468_v28 }
 0x6b5   :  { %v1122_v55 = vpop.eup %1121  ;;  %v507_v56 = vmul.f32 %v1094_v51, %v502_v53 }
 0x6b6   :  { %v493_v57 = vmul.f32 %v1122_v55, %v481_v48  ;;  %vm499_vm10 = vweird.f32 %v1122_v55 }
 0x6b7   :  { %v1422_v58 = vadd.f32 %v1095_v54, %v507_v56  ;;  %vm500_vm12 = vmor %vm498_vm11, %vm499_vm10 }
 0x6b8   :  { %v494_v59 = vmul.f32 %v1122_v55, %v493_v57 }
 0x6b9   :  { %1046 = vmatmul.msk.f32.vlgmr.msrb.gmra.mxu0 %vm68_vm1, %v1422_v58 }
 0x6ba   :  { %v495_v60 = vmul.f32 0.5, %v494_v59  ;;  %v1054_v59 = vld [vmem:[%s1556_s4 + $0x20] sm:$0xff] }
 0x6bc   :  { %v496_v61 = vsub.f32 1.5, %v495_v60 }
 0x6be   :  { %v497_v62 = vmul.f32 %v1122_v55, %v496_v61 }
 0x6c0   :  { %v501_v63 = vsel %vm500_vm12, %v1122_v55, %v497_v62  ;;  %v1097_v62 = vld [vmem:[%s1557_s5 + $0x1] ss:$0 sm:$0xff] }
 0x6c1   :  { %v503_v0 = vmul.f32 %v501_v63, %v469_v32 }
 0x6c3   :  { %v508_v1 = vmul.f32 %v1094_v51, %v503_v0 }
 0x6c5   :  { %v1426_v2 = vadd.f32 %v1095_v54, %v508_v1 }
 0x6c7   :  { %1047 = vmatmul.msk.f32.gmra.mxu0 %vm68_vm1, %v1426_v2 }
 0x736   :  { %v550_v4 = vpop.f32.mrf.mxu0 }
 0x737   :  { %v551_v6 = vadd.f32 %v1096_v3, %v550_v4 }
 0x739   :  { %558 = vrot.lane.b32.xlu2 %v551_v6, %s1165_s19  ;;  %v556_v11 = vmul.f32 0.18569534, %v551_v6 }
 0x744   :  { %v553_v7 = vpop.f32.mrf.mxu0 }
 0x745   :  { %v554_v9 = vadd.f32 %v1096_v3, %v553_v7 }
 0x747   :  { %637 = vrot.lane.b32.xlu0 %v554_v9, %s1165_s19  ;;  %v635_v13 = vmul.f32 0.18569534, %v554_v9 }
 0x793   :  { %v559_v10 = vpop.permute.xlu2 %558 }
 0x794   :  { %1048 = vmatpush.xpose.msk.msra.mxu1 %vm68_vm1, %v559_v10 }
 0x797   :  { %1049 = vmatmul.msk.f32.vlgmr.msra.gmra.mxu1 %vm68_vm1, %v556_v11 }
 0x7b9   :  { %v638_v12 = vpop.permute.xlu0 %637 }
 0x7ba   :  { %1051 = vmatpush.xpose.msk.msrb.mxu2 %vm68_vm1, %v638_v12 }
 0x7bd   :  { %1052 = vmatmul.msk.f32.vlgmr.msrb.gmra.mxu2 %vm68_vm1, %v635_v13 }
 0x814   :  { %v582_v14 = vpop.f32.mrf.mxu1 }
 0x815   :  { %v583_v15 = vadd.f32 %v582_v14, %v1313_v24 }
 0x817   :  { %v585_v16 = vsel %vm141_vm3, %v583_v15, -inf }
 0x818   :  { %586 = vmax.xlane.f32.xlu1 %v585_v16 }
 0x831   :  { %609 = vrot.lane.b32.xlu1 %v551_v6, %s1166_s17 }
 0x840   :  { %v661_v17 = vpop.f32.mrf.mxu2 }
 0x841   :  { %v662_v18 = vadd.f32 %v661_v17, %v1313_v24 }
 0x843   :  { %v664_v19 = vsel %vm141_vm3, %v662_v18, -inf }
 0x844   :  { %665 = vmax.xlane.f32.xlu0 %v664_v19  ;;  %v1066_v19 = vld [vmem:[%s1558_s6 + $0x30] sm:$0xff] }
 0x88b   :  { %v587_v20 = vpop.xlane.xlu1 %586 }
 0x88c   :  { %v588_v21 = vsub.f32 %v583_v15, %v587_v20  ;;  %v1065_v20 = vld [vmem:[%s1558_s6 + $0x28] sm:$0xff] }
 0x88e   :  { %v589_v22 = vmul.f32 1.442695, %v588_v21  ;;  %v1064_v21 = vld [vmem:[%s1558_s6 + $0x20] sm:$0xff] }
 0x890   :  { %1123 = vpow2.f32 %v589_v22 }
 0x896   :  { %v1124_v23 = vpop.eup %1123 }
 0x897   :  { %v591_v25 = vsel %vm141_vm3, %v1124_v23, 0.0 }
 0x898   :  { %592 = vadd.xlane.f32.xlu2 %v591_v25 }
 0x8a3   :  { %v610_v5 = vpop.permute.xlu1 %609 }
 0x8a4   :  { %630 = vmatpush.msra.mxu3 %v610_v5 }
 0x8a6   :  { %1059 = vmatpush.msk.msrb.mxu3 %vm85_vm0, %v1057_v42 }
 0x8a8   :  { %746 = vmatpush.msrb.mxu3 %v1056_v43 }
 0x8aa   :  { %747 = vmatpush.msrb.mxu3 %v1055_v44 }
 0x8ac   :  { %748 = vmatpush.msrb.mxu3 %v1054_v59 }
 0x8b7   :  { %v666_v27 = vpop.xlane.xlu0 %665 }
 0x8b8   :  { %v667_v28 = vsub.f32 %v662_v18, %v666_v27 }
 0x8ba   :  { %v668_v29 = vmul.f32 1.442695, %v667_v28 }
 0x8bc   :  { %1125 = vpow2.f32 %v668_v29 }
 0x8c2   :  { %v1126_v8 = vpop.eup %1125 }
 0x8c3   :  { %v670_v24 = vsel %vm141_vm3, %v1126_v8, 0.0 }
 0x8c4   :  { %671 = vadd.xlane.f32.xlu1 %v670_v24 }
 0x8dd   :  { %688 = vrot.lane.b32.xlu1 %v554_v9, %s1166_s17 }
 0x90b   :  { %v593_v30 = vpop.xlane.xlu2 %592 }
 0x90c   :  { %1127 = vrcp.f32 %v593_v30  ;;  %v605_v34 = vand.u32 2147483648, %v593_v30  ;;  %v603_v36 = vand.u32 2147483647, %v593_v30  ;;  %vm599_vm14 = vweird.f32 %v593_v30 }
 0x90e   :  { %v606_v38 = vor.u32 1.1754944e-38, %v605_v34  ;;  %vm604_vm2 = vcmp.eq.f32.partialorder %v603_v36, 8.507059e+37  ;;  %v1075_v36 = vld [vmem:[%s1560_s8 + $0x38] sm:$0xff] }
 0x90f   :  { %888 = vmatpush.msra.mxu2 %v1075_v36 }
 0x912   :  { %v1128_v31 = vpop.eup %1127 }
 0x913   :  { %v595_v32 = vmul.f32 %v1128_v31, %v593_v30  ;;  %vm600_vm13 = vweird.f32 %v1128_v31  ;;  %v1098_v30 = vld [vmem:[%s1562_s10 + $0x1] ss:$0 sm:$0xff] }
 0x914   :  { %vm601_vm15 = vmor %vm599_vm14, %vm600_vm13 }
 0x915   :  { %v596_v33 = vsub.f32 1.0, %v595_v32 }
 0x917   :  { %v597_v35 = vmul.f32 %v1128_v31, %v596_v33  ;;  %v1099_v33 = vld [vmem:[%s1563_s11 + $0x1] ss:$0 sm:$0xff] }
 0x919   :  { %v598_v37 = vadd.f32 %v1128_v31, %v597_v35 }
 0x91b   :  { %v602_v39 = vsel %vm601_vm15, %v1128_v31, %v598_v37 }
 0x91c   :  { %v607_v40 = vsel %vm604_vm2, %v606_v38, %v602_v39 }
 0x91d   :  { %v608_v41 = vmul.f32 %v1124_v23, %v607_v40 }
 0x91f   :  { %1050 = vmatmul.msk.f32.vlgmr.msra.gmra.mxu3 %vm141_vm3, %v608_v41 }
 0x937   :  { %v672_v45 = vpop.xlane.xlu1 %671 }
 0x938   :  { %1129 = vrcp.f32 %v672_v45  ;;  %v684_v51 = vand.u32 2147483648, %v672_v45  ;;  %vm678_vm5 = vweird.f32 %v672_v45  ;;  %v682_v52 = vand.u32 2147483647, %v672_v45 }
 0x93a   :  { %v685_v54 = vor.u32 1.1754944e-38, %v684_v51  ;;  %vm683_vm8 = vcmp.eq.f32.partialorder %v682_v52, 8.507059e+37  ;;  %v1073_v51 = vld [vmem:[%s1560_s8 + $0x28] sm:$0xff]  ;;  %v1072_v52 = vld [vmem:[%s1560_s8 + $0x20] sm:$0xff] }
 0x93e   :  { %v1130_v46 = vpop.eup %1129 }
 0x93f   :  { %v674_v47 = vmul.f32 %v1130_v46, %v672_v45  ;;  %vm679_vm4 = vweird.f32 %v1130_v46 }
 0x940   :  { %vm680_vm7 = vmor %vm678_vm5, %vm679_vm4  ;;  %vm965_vm5 = vcmask 1040384  }
 0x941   :  { %v675_v48 = vsub.f32 1.0, %v674_v47 }
 0x943   :  { %v676_v49 = vmul.f32 %v1130_v46, %v675_v48 }
 0x945   :  { %v677_v50 = vadd.f32 %v1130_v46, %v676_v49 }
 0x947   :  { %v681_v53 = vsel %vm680_vm7, %v1130_v46, %v677_v50  ;;  %v1074_v50 = vld [vmem:[%s1560_s8 + $0x30] sm:$0xff]  ;;  %vm1001_vm7 = vcmask 123904  }
 0x948   :  { %v686_v55 = vsel %vm683_vm8, %v685_v54, %v681_v53  ;;  %889 = vmatpush.msra.mxu2 %v1074_v50  ;;  %v1100_v53 = vld [vmem:[%s1559_s7 + $0x1] ss:$0 sm:$0xff]  ;;  %v1104_v50 = vld [vmem:[%s1567_s15] ss:$0 sm:$0xff] }
 0x949   :  { %v687_v57 = vmul.f32 %v1126_v8, %v686_v55 }
 0x94a   :  { %890 = vmatpush.msra.mxu2 %v1073_v51 }
 0x94c   :  { %891 = vmatpush.msra.mxu2 %v1072_v52 }
 0x94f   :  { %v689_v56 = vpop.permute.xlu1 %688 }
 0x950   :  { %709 = vmatpush.msrb.mxu1 %v689_v56 }
 0x951   :  { %1053 = vmatmul.msk.f32.vlgmr.msrb.gmra.mxu1 %vm141_vm3, %v687_v57 }
 0x9a2   :  { %v632_v60 = vpop.f32.mrf.mxu3 }
 0x9a3   :  { %1060 = vmatmul.msk.f32.vlgmr.msrb.gmra.mxu3 %vm68_vm1, %v632_v60 }
 0x9ce   :  { %v711_v61 = vpop.f32.mrf.mxu1 }
 0x9cf   :  { %1061 = vmatmul.msk.f32.gmra.mxu3 %vm68_vm1, %v711_v61  ;;  %v1101_v61 = vld [vmem:[%s1561_s9 + $0x1] ss:$0 sm:$0xff] }
 0xa26   :  { %v750_v63 = vpop.f32.mrf.mxu3 }
 0xa27   :  { %v751_v0 = vadd.f32 %v1097_v62, %v750_v63 }
 0xa29   :  { %v756_v1 = vadd.f32 %v751_v0, %v1422_v58 }
 0xa2b   :  { %v762_v3 = vsel %vm68_vm1, %v756_v1, 0.0 }
 0xa2c   :  { %763 = vadd.xlane.f32.xlu0 %v762_v3 }
 0xa52   :  { %v753_v4 = vpop.f32.mrf.mxu3 }
 0xa53   :  { %v754_v6 = vadd.f32 %v1097_v62, %v753_v4 }
 0xa55   :  { %v757_v7 = vadd.f32 %v754_v6, %v1426_v2  ;;  %v1067_v2 = vld [vmem:[%s1558_s6 + $0x38] sm:$0x1f]  ;;  %s1169_s6 = smov [#allocation2]  }
 0xa56   :  { %1069 = vmatpush.msk.msra.mxu0 %vm85_vm0, %v1067_v2  ;;  %s1008_s3 = sshll.u32 %s1169_s6, 4  ;;  %s1009_s3 = int_to_ptr.vmem [resolvable:$true] %s1008_s3 }
 0xa57   :  { %v765_v9 = vsel %vm68_vm1, %v757_v7, 0.0 }
 0xa58   :  { %766 = vadd.xlane.f32.xlu2 %v765_v9  ;;  %848 = vmatpush.msra.mxu0 %v1066_v19 }
 0xa5a   :  { %849 = vmatpush.msra.mxu0 %v1065_v20 }
 0xa5c   :  { %850 = vmatpush.msra.mxu0 %v1064_v21  ;;  %v970_v21 = vld [vmem:[%s1566_s14 + $0x18] sm:$0x1f] }
 0xa5d   :  { %1081 = vmatpush.msk.msra.mxu1 %vm85_vm0, %v970_v21 }
 0xa9f   :  { %v764_v10 = vpop.xlane.xlu0 %763 }
 0xaa0   :  { %v768_v11 = vmul.f32 %v764_v10, %v1346_v26 }
 0xaa2   :  { %v770_v12 = vsub.f32 %v756_v1, %v768_v11 }
 0xaa4   :  { %v772_v13 = vmul.f32 %v770_v12, %v770_v12 }
 0xaa6   :  { %v774_v14 = vsel %vm68_vm1, %v772_v13, 0.0 }
 0xaa7   :  { %775 = vadd.xlane.f32.xlu1 %v774_v14 }
 0xacb   :  { %v767_v15 = vpop.xlane.xlu2 %766 }
 0xacc   :  { %v769_v58 = vmul.f32 %v767_v15, %v1346_v26 }
 0xace   :  { %v771_v16 = vsub.f32 %v757_v7, %v769_v58 }
 0xad0   :  { %v773_v17 = vmul.f32 %v771_v16, %v771_v16 }
 0xad2   :  { %v777_v18 = vsel %vm68_vm1, %v773_v17, 0.0 }
 0xad3   :  { %778 = vadd.xlane.f32.xlu0 %v777_v18 }
 0xb1a   :  { %v776_v22 = vpop.xlane.xlu1 %775 }
 0xb1b   :  { %v780_v23 = vmul.f32 %v776_v22, %v1346_v26  ;;  %v969_v22 = vld [vmem:[%s1566_s14 + $0x10] sm:$0xff] }
 0xb1c   :  { %994 = vmatpush.msra.mxu1 %v969_v22 }
 0xb1d   :  { %v782_v25 = vadd.f32 1e-05, %v780_v23 }
 0xb1f   :  { %1131 = vrsqrt.f32 %v782_v25  ;;  %vm790_vm9 = vweird.f32 %v782_v25 }
 0xb25   :  { %v1132_v5 = vpop.eup %1131 }
 0xb26   :  { %v785_v27 = vmul.f32 %v1132_v5, %v782_v25  ;;  %vm791_vm3 = vweird.f32 %v1132_v5  ;;  %v968_v25 = vld [vmem:[%s1566_s14 + $0x8] sm:$0xff] }
 0xb27   :  { %vm792_vm10 = vmor %vm790_vm9, %vm791_vm3  ;;  %995 = vmatpush.msra.mxu1 %v968_v25 }
 0xb28   :  { %v786_v28 = vmul.f32 %v1132_v5, %v785_v27 }
 0xb2a   :  { %v787_v29 = vmul.f32 0.5, %v786_v28 }
 0xb2c   :  { %v788_v8 = vsub.f32 1.5, %v787_v29 }
 0xb2e   :  { %v789_v24 = vmul.f32 %v1132_v5, %v788_v8 }
 0xb30   :  { %v793_v31 = vsel %vm792_vm10, %v1132_v5, %v789_v24  ;;  %v967_v5 = vld [vmem:[%s1566_s14] sm:$0xff] }
 0xb31   :  { %v804_v32 = vmul.f32 %v793_v31, %v770_v12  ;;  %996 = vmatpush.msra.mxu1 %v967_v5 }
 0xb33   :  { %v809_v34 = vmul.f32 %v1098_v30, %v804_v32 }
 0xb35   :  { %v814_v35 = vadd.f32 %v1099_v33, %v809_v34 }
 0xb37   :  { %1070 = vmatmul.msk.f32.vlgmr.msra.gmra.mxu0 %vm68_vm1, %v814_v35 }
 0xb46   :  { %v779_v37 = vpop.xlane.xlu0 %778 }
 0xb47   :  { %v781_v38 = vmul.f32 %v779_v37, %v1346_v26  ;;  %v1102_v37 = vld [vmem:[%s1564_s12 + $0x1] ss:$0 sm:$0xff] }
 0xb49   :  { %v783_v39 = vadd.f32 1e-05, %v781_v38 }
 0xb4b   :  { %1133 = vrsqrt.f32 %v783_v39  ;;  %vm800_vm12 = vweird.f32 %v783_v39 }
 0xb51   :  { %v1134_v40 = vpop.eup %1133 }
 0xb52   :  { %v795_v41 = vmul.f32 %v1134_v40, %v783_v39  ;;  %vm801_vm11 = vweird.f32 %v1134_v40 }
 0xb53   :  { %vm802_vm13 = vmor %vm800_vm12, %vm801_vm11 }
 0xb54   :  { %v796_v42 = vmul.f32 %v1134_v40, %v795_v41  ;;  %v1103_v41 = vld [vmem:[%s1565_s13 + $0x1] ss:$0 sm:$0xff]  ;;  %s1010_s13 = sshll.u32 %s1568_s16, 4  ;;  %s1011_s13 = int_to_ptr.hbm [resolvable:$true] %s1010_s13 }
 0xb56   :  { %v797_v43 = vmul.f32 0.5, %v796_v42 }
 0xb58   :  { %v798_v44 = vsub.f32 1.5, %v797_v43 }
 0xb5a   :  { %v799_v45 = vmul.f32 %v1134_v40, %v798_v44 }
 0xb5c   :  { %v803_v46 = vsel %vm802_vm13, %v1134_v40, %v799_v45 }
 0xb5d   :  { %v805_v47 = vmul.f32 %v803_v46, %v771_v16 }
 0xb5f   :  { %v810_v48 = vmul.f32 %v1098_v30, %v805_v47 }
 0xb61   :  { %v815_v49 = vadd.f32 %v1099_v33, %v810_v48 }
 0xb63   :  { %1071 = vmatmul.msk.f32.gmra.mxu0 %vm68_vm1, %v815_v49 }
 0xbb4   :  { %v852_v54 = vpop.f32.mrf.mxu0 }
 0xbb5   :  { %v853_v55 = vadd.f32 %v1100_v53, %v852_v54 }
 0xbb7   :  { %v858_v56 = vmax.f32 %v853_v55, 0.0 }
 0xbb9   :  { %1077 = vmatmul.msk.f32.vlgmr.msra.gmra.mxu2 %vm426_vm6, %v858_v56 }
 0xbe0   :  { %v855_v57 = vpop.f32.mrf.mxu0 }
 0xbe1   :  { %v856_v59 = vadd.f32 %v1100_v53, %v855_v57 }
 0xbe3   :  { %v859_v60 = vmax.f32 %v856_v59, 0.0 }
 0xbe5   :  { %1078 = vmatmul.msk.f32.gmra.mxu2 %vm426_vm6, %v859_v60 }
 0xc3c   :  { %v893_v62 = vpop.f32.mrf.mxu2 }
 0xc3d   :  { %v894_v63 = vadd.f32 %v1101_v61, %v893_v62 }
 0xc3f   :  { %v899_v0 = vadd.f32 %v894_v63, %v814_v35 }
 0xc41   :  { %v905_v1 = vsel %vm68_vm1, %v899_v0, 0.0 }
 0xc42   :  { %906 = vadd.xlane.f32.xlu2 %v905_v1 }
 0xc68   :  { %v896_v3 = vpop.f32.mrf.mxu2 }
 0xc69   :  { %v897_v4 = vadd.f32 %v1101_v61, %v896_v3 }
 0xc6b   :  { %v900_v6 = vadd.f32 %v897_v4, %v815_v49 }
 0xc6d   :  { %v908_v7 = vsel %vm68_vm1, %v900_v6, 0.0 }
 0xc6e   :  { %909 = vadd.xlane.f32.xlu0 %v908_v7 }
 0xcb5   :  { %v907_v9 = vpop.xlane.xlu2 %906 }
 0xcb6   :  { %v911_v10 = vmul.f32 %v907_v9, %v1346_v26 }
 0xcb8   :  { %v913_v11 = vsub.f32 %v899_v0, %v911_v10 }
 0xcba   :  { %v915_v12 = vmul.f32 %v913_v11, %v913_v11 }
 0xcbc   :  { %v917_v13 = vsel %vm68_vm1, %v915_v12, 0.0 }
 0xcbd   :  { %918 = vadd.xlane.f32.xlu2 %v917_v13 }
 0xce1   :  { %v910_v14 = vpop.xlane.xlu0 %909 }
 0xce2   :  { %v912_v15 = vmul.f32 %v910_v14, %v1346_v26 }
 0xce4   :  { %v914_v58 = vsub.f32 %v900_v6, %v912_v15 }
 0xce6   :  { %v916_v16 = vmul.f32 %v914_v58, %v914_v58 }
 0xce8   :  { %v920_v17 = vsel %vm68_vm1, %v916_v16, 0.0 }
 0xce9   :  { %921 = vadd.xlane.f32.xlu0 %v920_v17 }
 0xd30   :  { %v919_v18 = vpop.xlane.xlu2 %918 }
 0xd31   :  { %v923_v2 = vmul.f32 %v919_v18, %v1346_v26 }
 0xd33   :  { %v925_v19 = vadd.f32 1e-05, %v923_v2 }
 0xd35   :  { %1135 = vrsqrt.f32 %v925_v19  ;;  %vm933_vm6 = vweird.f32 %v925_v19 }
 0xd3b   :  { %v1136_v20 = vpop.eup %1135 }
 0xd3c   :  { %v928_v23 = vmul.f32 %v1136_v20, %v925_v19  ;;  %vm934_vm0 = vweird.f32 %v1136_v20 }
 0xd3d   :  { %vm935_vm14 = vmor %vm933_vm6, %vm934_vm0 }
 0xd3e   :  { %v929_v27 = vmul.f32 %v1136_v20, %v928_v23 }
 0xd40   :  { %v930_v8 = vmul.f32 0.5, %v929_v27 }
 0xd42   :  { %v931_v30 = vsub.f32 1.5, %v930_v8 }
 0xd44   :  { %v932_v31 = vmul.f32 %v1136_v20, %v931_v30 }
 0xd46   :  { %v936_v34 = vsel %vm935_vm14, %v1136_v20, %v932_v31 }
 0xd47   :  { %v947_v38 = vmul.f32 %v936_v34, %v913_v11 }
 0xd49   :  { %v952_v40 = vmul.f32 %v1102_v37, %v947_v38 }
 0xd4b   :  { %v957_v45 = vadd.f32 %v1103_v41, %v952_v40 }
 0xd4d   :  { %v960_v47 = vrot.slane %v957_v45, 7 }
 0xd5c   :  { %v922_v28 = vpop.xlane.xlu0 %921 }
 0xd5d   :  { %v924_v29 = vmul.f32 %v922_v28, %v1346_v26 }
 0xd5f   :  { %v926_v24 = vadd.f32 1e-05, %v924_v29 }
 0xd61   :  { %1137 = vrsqrt.f32 %v926_v24  ;;  %vm943_vm2 = vweird.f32 %v926_v24 }
 0xd67   :  { %v1138_v32 = vpop.eup %1137 }
 0xd68   :  { %v938_v33 = vmul.f32 %v1138_v32, %v926_v24  ;;  %vm944_vm15 = vweird.f32 %v1138_v32 }
 0xd69   :  { %vm945_vm4 = vmor %vm943_vm2, %vm944_vm15 }
 0xd6a   :  { %v939_v35 = vmul.f32 %v1138_v32, %v938_v33 }
 0xd6c   :  { %v940_v36 = vmul.f32 0.5, %v939_v35 }
 0xd6e   :  { %v941_v39 = vsub.f32 1.5, %v940_v36 }
 0xd70   :  { %v942_v26 = vmul.f32 %v1138_v32, %v941_v39 }
 0xd72   :  { %v946_v42 = vsel %vm945_vm4, %v1138_v32, %v942_v26 }
 0xd73   :  { %v948_v43 = vmul.f32 %v946_v42, %v914_v58 }
 0xd75   :  { %v953_v44 = vmul.f32 %v1102_v37, %v948_v43 }
 0xd77   :  { %v958_v46 = vadd.f32 %v1103_v41, %v953_v44 }
 0xd79   :  { %v963_v48 = vrot.slane %v958_v46, 6 }
 0xd7b   :  { %v966_v49 = vsel %vm965_vm5, %v960_v47, %v963_v48 }
 0xd7c   :  { %1082 = vmatmul.msk.f32.vlgmr.msra.gmra.mxu1 %vm68_vm1, %v966_v49 }
 0xdf9   :  { %v998_v51 = vpop.f32.mrf.mxu1 }
 0xdfa   :  { %v999_v52 = vadd.f32 %v1104_v50, %v998_v51 }
 0xdfc   :  { %1002 = vst.msk [vmem:[#allocation2] sm:$0x3] %vm1001_vm7, %v999_v52 }
 0xdfd   :  { %1013 = dma.vmem_to_hbm [thread:$0]  %s1009_s3, 32, %s1011_s13, [#allocation3]  }
 0xdfe   :  { %1163 = dma.done.wait [#allocation3], 32  }
 0xdff   :  { %1164 = vsyncadd [#allocation3], 4294967264 }
 0xe00   :  { %1022 = vsyncpa [#allocation3], 1 }

</bundles_post_ra>
